<compile_context>
chip_gen: v6e
topology: v6e:2x2x1
jax: 0.10.0
libtpu: 0.0.40
codegen_flags: <defaults>
</compile_context>

<pallas_src>
import math

import jax
import jax.numpy as jnp
import numpy as np
from jax import lax
from jax.experimental import pallas as pl
from jax.experimental.pallas import tpu as pltpu

# Model hyper-parameters (consistent with the module's __init__).
D = 32            # attention / model size
H = 64            # feed-forward hidden units
NH = 4            # cross-attention heads
DK = D // NH      # per-head dim
K = 11            # FSMN kernel size
LPAD = (K - 1) // 2
RPAD = K - 1 - LPAD
EPS = 1e-12       # LayerNorm eps (must only match the in-script reference)

# Row layout of the packed "small parameters" slab (each row padded to 128 lanes).
(R_N1G, R_N1B, R_B1, R_NFG, R_NFB, R_N2G, R_N2B, R_N3G, R_N3B,
 R_BQ, R_BK, R_BV, R_BO) = range(13)
R_WF0 = 16                         # FSMN conv weights occupy rows [R_WF0, R_WF0+K)
VEC_ROWS_PAD = 32                  # pad row count to a multiple of 8
VEC_LANES = 128


def decoder_layer_kernel(tgt_ref, mem_ref, vec_ref, w1_ref, w2_ref, wqkvo_ref,
                         out_ref, fsmn_ref):
    f32 = jnp.float32
    bf16 = jnp.bfloat16
    B, T, _ = tgt_ref.shape
    S = mem_ref.shape[1]
    BT = B * T

    def ln(x, g, b):
        mu = jnp.mean(x, axis=-1, keepdims=True)
        var = jnp.mean((x - mu) ** 2, axis=-1, keepdims=True)
        return (x - mu) * lax.rsqrt(var + EPS) * g + b

    vecs = vec_ref[...]                                # (32, 128) packed small params

    def vec_row(r, n):
        return vecs[r:r + 1, 0:n]                      # (1, n)

    tgt2 = tgt_ref[...].reshape(BT, D)                 # (BT, D)
    mem2 = mem_ref[...].reshape(B * S, D)              # (B*S, D)

    # ---- feed_forward(norm1(tgt)) : PositionwiseFeedForwardDecoderSANM ----
    n1 = ln(tgt2, vec_row(R_N1G, D), vec_row(R_N1B, D))
    h = jnp.dot(n1.astype(bf16), w1_ref[...].astype(bf16),
                preferred_element_type=f32) + vec_row(R_B1, H)
    h = jnp.maximum(h, 0.0)
    hn = ln(h, vec_row(R_NFG, H), vec_row(R_NFB, H))
    ff = jnp.dot(hn.astype(bf16), w2_ref[...].astype(bf16),
                 preferred_element_type=f32)           # (BT, D)

    # ---- self_attn(norm2(ff)) : FSMN depthwise conv over time -------------
    n2 = ln(ff, vec_row(R_N2G, D), vec_row(R_N2B, D))  # (BT, D)
    fsmn_ref[...] = jnp.zeros(fsmn_ref.shape, f32)
    fsmn_ref[:, LPAD:LPAD + T, :] = n2.reshape(B, T, D)
    conv = jnp.zeros((B, T, D), f32)
    for k in range(K):                                 # K shifted VPU FMAs
        wf_k = vecs[R_WF0 + k:R_WF0 + k + 1, 0:D].reshape(1, 1, D)
        conv = conv + fsmn_ref[:, k:k + T, :] * wf_k
    x2 = tgt2 + n2 + conv.reshape(BT, D)               # (BT, D)

    # ---- src_attn(norm3(x), memory) : multi-head cross attention ----------
    n3 = ln(x2, vec_row(R_N3G, D), vec_row(R_N3B, D))
    q = jnp.dot(n3.astype(bf16), wqkvo_ref[0].astype(bf16),
                preferred_element_type=f32) + vec_row(R_BQ, D)     # (BT, D)
    mem_b16 = mem2.astype(bf16)
    kk = jnp.dot(mem_b16, wqkvo_ref[1].astype(bf16),
                 preferred_element_type=f32) + vec_row(R_BK, D)    # (B*S, D)
    vv = jnp.dot(mem_b16, wqkvo_ref[2].astype(bf16),
                 preferred_element_type=f32) + vec_row(R_BV, D)    # (B*S, D)
    kk_b16 = kk.astype(bf16)                                       # hoisted casts
    vv_b16 = vv.astype(bf16)

    # Head mask: sublane-block h of a (NH*T, D) array keeps only head-h channels.
    d_idx = lax.broadcasted_iota(jnp.int32, (T, D), 1)
    mask_full = jnp.concatenate(
        [((d_idx >= hh * DK) & (d_idx < (hh + 1) * DK)).astype(f32)
         for hh in range(NH)], axis=0)                             # (NH*T, D)

    scale = 1.0 / math.sqrt(DK)
    att_parts = []
    for b in range(B):                                             # static, B=2
        qb = q[b * T:(b + 1) * T, :]                               # (T, D)
        kb = kk_b16[b * S:(b + 1) * S, :]                          # (S, D)
        vb = vv_b16[b * S:(b + 1) * S, :]                          # (S, D)
        q_stk = jnp.concatenate([qb] * NH, axis=0) * mask_full     # (NH*T, D)
        scores = lax.dot_general(
            q_stk.astype(bf16), kb,
            (((1,), (1,)), ((), ())),
            preferred_element_type=f32) * scale                    # (NH*T, S)
        m = jnp.max(scores, axis=-1, keepdims=True)
        e = jnp.exp(scores - m)
        inv_den = pl.reciprocal(jnp.sum(e, axis=-1, keepdims=True), approx=True)
        p = e * inv_den
        o = jnp.dot(p.astype(bf16), vb,
                    preferred_element_type=f32) * mask_full        # (NH*T, D)
        att_b = o[0:T, :]
        for hh in range(1, NH):                                    # recombine heads
            att_b = att_b + o[hh * T:(hh + 1) * T, :]
        att_parts.append(att_b)
    att = jnp.concatenate(att_parts, axis=0)                       # (BT, D)

    # Output projection kept in f32 for accuracy of the final residual sum.
    ca = jnp.dot(att, wqkvo_ref[3], preferred_element_type=f32) + vec_row(R_BO, D)
    out_ref[...] = (x2 + ca).reshape(B, T, D)          # single full-tile store


def pack_params(p):
    """Pack the many tiny parameter tensors into a few TPU-friendly arrays."""
    vec = jnp.zeros((VEC_ROWS_PAD, VEC_LANES), jnp.float32)

    def put(v, row, arr):
        a = jnp.asarray(arr, jnp.float32).reshape(-1)
        return v.at[row, :a.shape[0]].set(a)

    vec = put(vec, R_N1G, p["n1_g"]); vec = put(vec, R_N1B, p["n1_b"])
    vec = put(vec, R_B1, p["b1"])
    vec = put(vec, R_NFG, p["nf_g"]); vec = put(vec, R_NFB, p["nf_b"])
    vec = put(vec, R_N2G, p["n2_g"]); vec = put(vec, R_N2B, p["n2_b"])
    vec = put(vec, R_N3G, p["n3_g"]); vec = put(vec, R_N3B, p["n3_b"])
    vec = put(vec, R_BQ, p["bq"]); vec = put(vec, R_BK, p["bk"])
    vec = put(vec, R_BV, p["bv"]); vec = put(vec, R_BO, p["bo"])
    vec = vec.at[R_WF0:R_WF0 + K, :D].set(p["wf"])
    wqkvo = jnp.stack([p["wq"], p["wk"], p["wv"], p["wo"]], axis=0)  # (4, D, D)
    return vec, p["w1"], p["w2"], wqkvo


def decoder_layer_sanm(tgt, memory, params):
    B, T, _ = tgt.shape
    S = memory.shape[1]
    vec, w1, w2, wqkvo = pack_params(params)

    out = pl.pallas_call(
        decoder_layer_kernel,
        out_shape=jax.ShapeDtypeStruct((B, T, D), jnp.float32),
        grid=(1,),                                    # whole batch in one step
        in_specs=[
            pl.BlockSpec((B, T, D), lambda i: (0, 0, 0)),
            pl.BlockSpec((B, S, D), lambda i: (0, 0, 0)),
            pl.BlockSpec((VEC_ROWS_PAD, VEC_LANES), lambda i: (0, 0)),
            pl.BlockSpec((D, H), lambda i: (0, 0)),
            pl.BlockSpec((H, D), lambda i: (0, 0)),
            pl.BlockSpec((4, D, D), lambda i: (0, 0, 0)),
        ],
        out_specs=pl.BlockSpec((B, T, D), lambda i: (0, 0, 0)),
        scratch_shapes=[pltpu.VMEM((B, T + K - 1, D), jnp.float32)],
        compiler_params=pltpu.CompilerParams(
            dimension_semantics=("arbitrary",)),
    )(tgt, memory, vec, w1, w2, wqkvo)
    return out, memory


def reference(tgt, memory, p):
    """Pure-JAX f32 reference replicating the PyTorch forward semantics."""
    def ln(x, g, b):
        mu = jnp.mean(x, axis=-1, keepdims=True)
        var = jnp.mean((x - mu) ** 2, axis=-1, keepdims=True)
        return (x - mu) * lax.rsqrt(var + EPS) * g + b

    B, T, _ = tgt.shape
    n1 = ln(tgt, p["n1_g"], p["n1_b"])
    h = jax.nn.relu(n1 @ p["w1"] + p["b1"])
    hn = ln(h, p["nf_g"], p["nf_b"])
    ff = hn @ p["w2"]

    n2 = ln(ff, p["n2_g"], p["n2_b"])
    padded = jnp.pad(n2, ((0, 0), (LPAD, RPAD), (0, 0)))
    conv = jnp.zeros_like(n2)
    for k in range(K):
        conv = conv + padded[:, k:k + T, :] * p["wf"][k][None, None, :]
    x = tgt + (conv + n2)

    n3 = ln(x, p["n3_g"], p["n3_b"])
    q = n3 @ p["wq"] + p["bq"]
    kk = memory @ p["wk"] + p["bk"]
    vv = memory @ p["wv"] + p["bv"]
    qh = q.reshape(B, T, NH, DK).transpose(0, 2, 1, 3)
    kh = kk.reshape(B, -1, NH, DK).transpose(0, 2, 1, 3)
    vh = vv.reshape(B, -1, NH, DK).transpose(0, 2, 1, 3)
    scores = jnp.einsum("bhtd,bhsd->bhts", qh, kh) / math.sqrt(DK)
    attn = jax.nn.softmax(scores, axis=-1)
    oh = jnp.einsum("bhts,bhsd->bhtd", attn, vh)
    att = oh.transpose(0, 2, 1, 3).reshape(B, T, D)
    ca = att @ p["wo"] + p["bo"]
    return x + ca, memory


def init_params(key):
    ks = jax.random.split(key, 16)
    rnd = lambda k, shape: (0.1 * jax.random.normal(k, shape)).astype(jnp.float32)
    p = {
        # LayerNorms: fresh (gamma=1, beta=0), as in the torch module
        "n1_g": jnp.ones((1, D), jnp.float32), "n1_b": jnp.zeros((1, D), jnp.float32),
        "nf_g": jnp.ones((1, H), jnp.float32), "nf_b": jnp.zeros((1, H), jnp.float32),
        "n2_g": jnp.ones((1, D), jnp.float32), "n2_b": jnp.zeros((1, D), jnp.float32),
        "n3_g": jnp.ones((1, D), jnp.float32), "n3_b": jnp.zeros((1, D), jnp.float32),
        # PositionwiseFeedForwardDecoderSANM
        "w1": rnd(ks[0], (D, H)), "b1": rnd(ks[1], (1, H)),
        "w2": rnd(ks[2], (H, D)),                      # bias=False
        # FSMN depthwise conv weight, (K, D)
        "wf": rnd(ks[3], (K, D)),
        # MultiHeadedAttentionCrossAtt (linear_k_v split into k / v parts)
        "wq": rnd(ks[4], (D, D)), "bq": rnd(ks[5], (1, D)),
        "wk": rnd(ks[6], (D, D)), "bk": rnd(ks[7], (1, D)),
        "wv": rnd(ks[8], (D, D)), "bv": rnd(ks[9], (1, D)),
        "wo": rnd(ks[10], (D, D)), "bo": rnd(ks[11], (1, D)),
    }
    return p


if __name__ == "__main__":
    B, T, S = 2, 8, 16
    key = jax.random.PRNGKey(0)
    k_tgt, k_mem, k_par = jax.random.split(key, 3)
    tgt = jax.random.normal(k_tgt, (B, T, D), jnp.float32)
    memory = jax.random.normal(k_mem, (B, S, D), jnp.float32)
    params = init_params(k_par)

    out, mem_out = decoder_layer_sanm(tgt, memory, params)
    out = jax.block_until_ready(out)

    ref, _ = reference(tgt, memory, params)
    # Tolerance reflects bf16 matmul operands (f32 accumulation) in the kernel.
    assert np.allclose(np.asarray(out), np.asarray(ref), rtol=3e-2, atol=3e-2)
    # TODO(synk): dropout / masks / cache paths (forward_one_step, forward_chunk) are
    # no-ops or unused in forward() and are not implemented.
    print("KERNEL_OK")
</pallas_src>

<mosaic_0001>
module attributes {stable_mosaic.version = 11 : i64} {
  func.func @decoder_layer_kernel(%arg0: i32, %arg1: memref<2x8x32xf32, #tpu.memory_space<vmem>>, %arg2: memref<2x16x32xf32, #tpu.memory_space<vmem>>, %arg3: memref<32x128xf32, #tpu.memory_space<vmem>>, %arg4: memref<32x64xf32, #tpu.memory_space<vmem>>, %arg5: memref<64x32xf32, #tpu.memory_space<vmem>>, %arg6: memref<4x32x32xf32, #tpu.memory_space<vmem>>, %arg7: memref<2x8x32xf32, #tpu.memory_space<vmem>>, %arg8: memref<2x18x32xf32, #tpu.memory_space<vmem>>) attributes {dimension_semantics = [#tpu.dimension_semantics<arbitrary>], iteration_bounds = array<i64: 1>, scalar_prefetch = 0 : i64, scratch_operands = 1 : i64, tpu.core_type = #tpu.core_type<tc>, window_params = [{pipeline_mode = #tpu.pipeline_mode<synchronous>, transform_indices = @transform_0, window_bounds = array<i64: 2, 8, 32>}, {pipeline_mode = #tpu.pipeline_mode<synchronous>, transform_indices = @transform_1, window_bounds = array<i64: 2, 16, 32>}, {pipeline_mode = #tpu.pipeline_mode<synchronous>, transform_indices = @transform_2, window_bounds = array<i64: 32, 128>}, {pipeline_mode = #tpu.pipeline_mode<synchronous>, transform_indices = @transform_3, window_bounds = array<i64: 32, 64>}, {pipeline_mode = #tpu.pipeline_mode<synchronous>, transform_indices = @transform_4, window_bounds = array<i64: 64, 32>}, {pipeline_mode = #tpu.pipeline_mode<synchronous>, transform_indices = @transform_5, window_bounds = array<i64: 4, 32, 32>}, {pipeline_mode = #tpu.pipeline_mode<synchronous>, transform_indices = @transform_6, window_bounds = array<i64: 2, 8, 32>}]} {
    %c0 = arith.constant 0 : index
    %c0_0 = arith.constant 0 : index
    %0 = vector.load %arg3[%c0, %c0_0] : memref<32x128xf32, #tpu.memory_space<vmem>>, vector<32x128xf32>
    %c0_1 = arith.constant 0 : index
    %c0_2 = arith.constant 0 : index
    %c0_3 = arith.constant 0 : index
    %1 = vector.load %arg1[%c0_1, %c0_2, %c0_3] : memref<2x8x32xf32, #tpu.memory_space<vmem>>, vector<2x8x32xf32>
    %2 = vector.shape_cast %1 : vector<2x8x32xf32> to vector<16x32xf32>
    %c0_4 = arith.constant 0 : index
    %c0_5 = arith.constant 0 : index
    %c0_6 = arith.constant 0 : index
    %3 = vector.load %arg2[%c0_4, %c0_5, %c0_6] : memref<2x16x32xf32, #tpu.memory_space<vmem>>, vector<2x16x32xf32>
    %4 = vector.shape_cast %3 : vector<2x16x32xf32> to vector<32x32xf32>
    %5 = vector.extract_strided_slice %0 {offsets = [0, 0], sizes = [1, 32], strides = [1, 1]} : vector<32x128xf32> to vector<1x32xf32>
    %6 = vector.extract_strided_slice %0 {offsets = [1, 0], sizes = [1, 32], strides = [1, 1]} : vector<32x128xf32> to vector<1x32xf32>
    %cst = arith.constant dense<0.000000e+00> : vector<16xf32>
    %7 = vector.multi_reduction <add>, %2, %cst [1] : vector<16x32xf32> to vector<16xf32>
    %8 = vector.shape_cast %7 : vector<16xf32> to vector<16x1xf32>
    %cst_7 = arith.constant 3.200000e+01 : f32
    %9 = vector.broadcast %cst_7 : f32 to vector<16x1xf32>
    %10 = arith.divf %8, %9 : vector<16x1xf32>
    %11 = vector.broadcast %10 : vector<16x1xf32> to vector<16x32xf32>
    %12 = arith.subf %2, %11 : vector<16x32xf32>
    %13 = arith.mulf %12, %12 : vector<16x32xf32>
    %cst_8 = arith.constant dense<0.000000e+00> : vector<16xf32>
    %14 = vector.multi_reduction <add>, %13, %cst_8 [1] : vector<16x32xf32> to vector<16xf32>
    %15 = vector.shape_cast %14 : vector<16xf32> to vector<16x1xf32>
    %cst_9 = arith.constant 3.200000e+01 : f32
    %16 = vector.broadcast %cst_9 : f32 to vector<16x1xf32>
    %17 = arith.divf %15, %16 : vector<16x1xf32>
    %18 = vector.broadcast %10 : vector<16x1xf32> to vector<16x32xf32>
    %19 = arith.subf %2, %18 : vector<16x32xf32>
    %cst_10 = arith.constant 9.99999996E-13 : f32
    %20 = vector.broadcast %cst_10 : f32 to vector<16x1xf32>
    %21 = arith.addf %17, %20 : vector<16x1xf32>
    %22 = math.rsqrt %21 : vector<16x1xf32>
    %23 = vector.broadcast %22 : vector<16x1xf32> to vector<16x32xf32>
    %24 = arith.mulf %19, %23 : vector<16x32xf32>
    %25 = vector.broadcast %5 : vector<1x32xf32> to vector<16x32xf32>
    %26 = arith.mulf %24, %25 : vector<16x32xf32>
    %27 = vector.broadcast %6 : vector<1x32xf32> to vector<16x32xf32>
    %28 = arith.addf %26, %27 : vector<16x32xf32>
    %29 = arith.truncf %28 : vector<16x32xf32> to vector<16x32xbf16>
    %c0_11 = arith.constant 0 : index
    %c0_12 = arith.constant 0 : index
    %30 = vector.load %arg4[%c0_11, %c0_12] : memref<32x64xf32, #tpu.memory_space<vmem>>, vector<32x64xf32>
    %31 = arith.truncf %30 : vector<32x64xf32> to vector<32x64xbf16>
    %cst_13 = arith.constant dense<0.000000e+00> : vector<16x64xf32>
    %32 = tpu.matmul %29, %31, %cst_13 {dimension_numbers = #tpu.dot_dimension_numbers<[1], [0], [0], [1], [0, 0, 1, 1], [], []>} : vector<16x32xbf16>, vector<32x64xbf16>, vector<16x64xf32> -> vector<16x64xf32>
    %33 = vector.extract_strided_slice %0 {offsets = [2, 0], sizes = [1, 64], strides = [1, 1]} : vector<32x128xf32> to vector<1x64xf32>
    %34 = vector.broadcast %33 : vector<1x64xf32> to vector<16x64xf32>
    %35 = arith.addf %32, %34 : vector<16x64xf32>
    %cst_14 = arith.constant 0.000000e+00 : f32
    %36 = vector.broadcast %cst_14 : f32 to vector<16x64xf32>
    %37 = arith.maximumf %35, %36 : vector<16x64xf32>
    %38 = vector.extract_strided_slice %0 {offsets = [3, 0], sizes = [1, 64], strides = [1, 1]} : vector<32x128xf32> to vector<1x64xf32>
    %39 = vector.extract_strided_slice %0 {offsets = [4, 0], sizes = [1, 64], strides = [1, 1]} : vector<32x128xf32> to vector<1x64xf32>
    %cst_15 = arith.constant dense<0.000000e+00> : vector<16xf32>
    %40 = vector.multi_reduction <add>, %37, %cst_15 [1] : vector<16x64xf32> to vector<16xf32>
    %41 = vector.shape_cast %40 : vector<16xf32> to vector<16x1xf32>
    %cst_16 = arith.constant 6.400000e+01 : f32
    %42 = vector.broadcast %cst_16 : f32 to vector<16x1xf32>
    %43 = arith.divf %41, %42 : vector<16x1xf32>
    %44 = vector.broadcast %43 : vector<16x1xf32> to vector<16x64xf32>
    %45 = arith.subf %37, %44 : vector<16x64xf32>
    %46 = arith.mulf %45, %45 : vector<16x64xf32>
    %cst_17 = arith.constant dense<0.000000e+00> : vector<16xf32>
    %47 = vector.multi_reduction <add>, %46, %cst_17 [1] : vector<16x64xf32> to vector<16xf32>
    %48 = vector.shape_cast %47 : vector<16xf32> to vector<16x1xf32>
    %cst_18 = arith.constant 6.400000e+01 : f32
    %49 = vector.broadcast %cst_18 : f32 to vector<16x1xf32>
    %50 = arith.divf %48, %49 : vector<16x1xf32>
    %51 = vector.broadcast %43 : vector<16x1xf32> to vector<16x64xf32>
    %52 = arith.subf %37, %51 : vector<16x64xf32>
    %cst_19 = arith.constant 9.99999996E-13 : f32
    %53 = vector.broadcast %cst_19 : f32 to vector<16x1xf32>
    %54 = arith.addf %50, %53 : vector<16x1xf32>
    %55 = math.rsqrt %54 : vector<16x1xf32>
    %56 = vector.broadcast %55 : vector<16x1xf32> to vector<16x64xf32>
    %57 = arith.mulf %52, %56 : vector<16x64xf32>
    %58 = vector.broadcast %38 : vector<1x64xf32> to vector<16x64xf32>
    %59 = arith.mulf %57, %58 : vector<16x64xf32>
    %60 = vector.broadcast %39 : vector<1x64xf32> to vector<16x64xf32>
    %61 = arith.addf %59, %60 : vector<16x64xf32>
    %62 = arith.truncf %61 : vector<16x64xf32> to vector<16x64xbf16>
    %c0_20 = arith.constant 0 : index
    %c0_21 = arith.constant 0 : index
    %63 = vector.load %arg5[%c0_20, %c0_21] : memref<64x32xf32, #tpu.memory_space<vmem>>, vector<64x32xf32>
    %64 = arith.truncf %63 : vector<64x32xf32> to vector<64x32xbf16>
    %cst_22 = arith.constant dense<0.000000e+00> : vector<16x32xf32>
    %65 = tpu.matmul %62, %64, %cst_22 {dimension_numbers = #tpu.dot_dimension_numbers<[1], [0], [0], [1], [0, 0, 1, 1], [], []>} : vector<16x64xbf16>, vector<64x32xbf16>, vector<16x32xf32> -> vector<16x32xf32>
    %66 = vector.extract_strided_slice %0 {offsets = [5, 0], sizes = [1, 32], strides = [1, 1]} : vector<32x128xf32> to vector<1x32xf32>
    %67 = vector.extract_strided_slice %0 {offsets = [6, 0], sizes = [1, 32], strides = [1, 1]} : vector<32x128xf32> to vector<1x32xf32>
    %cst_23 = arith.constant dense<0.000000e+00> : vector<16xf32>
    %68 = vector.multi_reduction <add>, %65, %cst_23 [1] : vector<16x32xf32> to vector<16xf32>
    %69 = vector.shape_cast %68 : vector<16xf32> to vector<16x1xf32>
    %cst_24 = arith.constant 3.200000e+01 : f32
    %70 = vector.broadcast %cst_24 : f32 to vector<16x1xf32>
    %71 = arith.divf %69, %70 : vector<16x1xf32>
    %72 = vector.broadcast %71 : vector<16x1xf32> to vector<16x32xf32>
    %73 = arith.subf %65, %72 : vector<16x32xf32>
    %74 = arith.mulf %73, %73 : vector<16x32xf32>
    %cst_25 = arith.constant dense<0.000000e+00> : vector<16xf32>
    %75 = vector.multi_reduction <add>, %74, %cst_25 [1] : vector<16x32xf32> to vector<16xf32>
    %76 = vector.shape_cast %75 : vector<16xf32> to vector<16x1xf32>
    %cst_26 = arith.constant 3.200000e+01 : f32
    %77 = vector.broadcast %cst_26 : f32 to vector<16x1xf32>
    %78 = arith.divf %76, %77 : vector<16x1xf32>
    %79 = vector.broadcast %71 : vector<16x1xf32> to vector<16x32xf32>
    %80 = arith.subf %65, %79 : vector<16x32xf32>
    %cst_27 = arith.constant 9.99999996E-13 : f32
    %81 = vector.broadcast %cst_27 : f32 to vector<16x1xf32>
    %82 = arith.addf %78, %81 : vector<16x1xf32>
    %83 = math.rsqrt %82 : vector<16x1xf32>
    %84 = vector.broadcast %83 : vector<16x1xf32> to vector<16x32xf32>
    %85 = arith.mulf %80, %84 : vector<16x32xf32>
    %86 = vector.broadcast %66 : vector<1x32xf32> to vector<16x32xf32>
    %87 = arith.mulf %85, %86 : vector<16x32xf32>
    %88 = vector.broadcast %67 : vector<1x32xf32> to vector<16x32xf32>
    %89 = arith.addf %87, %88 : vector<16x32xf32>
    %cst_28 = arith.constant 0.000000e+00 : f32
    %90 = vector.broadcast %cst_28 : f32 to vector<2x18x32xf32>
    %c0_29 = arith.constant 0 : index
    %c0_30 = arith.constant 0 : index
    %c0_31 = arith.constant 0 : index
    %91 = vector.load %arg8[%c0_29, %c0_30, %c0_31] : memref<2x18x32xf32, #tpu.memory_space<vmem>>, vector<2x18x32xf32>
    tpu.vector_store %arg8[%c0_29, %c0_30, %c0_31], %90 {strides = array<i32>} : memref<2x18x32xf32, #tpu.memory_space<vmem>>, vector<2x18x32xf32>,
    %92 = vector.shape_cast %89 : vector<16x32xf32> to vector<2x8x32xf32>
    %c0_32 = arith.constant 0 : index
    %c5 = arith.constant 5 : index
    %c0_33 = arith.constant 0 : index
    %93 = vector.load %arg8[%c0_32, %c5, %c0_33] : memref<2x18x32xf32, #tpu.memory_space<vmem>>, vector<2x8x32xf32>
    tpu.vector_store %arg8[%c0_32, %c5, %c0_33], %92 {strides = array<i32>} : memref<2x18x32xf32, #tpu.memory_space<vmem>>, vector<2x8x32xf32>,
    %cst_34 = arith.constant 0.000000e+00 : f32
    %94 = vector.broadcast %cst_34 : f32 to vector<2x8x32xf32>
    %95 = vector.extract_strided_slice %0 {offsets = [16, 0], sizes = [1, 32], strides = [1, 1]} : vector<32x128xf32> to vector<1x32xf32>
    %96 = vector.shape_cast %95 : vector<1x32xf32> to vector<1x1x32xf32>
    %c0_35 = arith.constant 0 : index
    %c0_36 = arith.constant 0 : index
    %c0_37 = arith.constant 0 : index
    %97 = vector.load %arg8[%c0_35, %c0_36, %c0_37] : memref<2x18x32xf32, #tpu.memory_space<vmem>>, vector<2x8x32xf32>
    %98 = vector.broadcast %96 : vector<1x1x32xf32> to vector<2x8x32xf32>
    %99 = arith.mulf %97, %98 : vector<2x8x32xf32>
    %100 = arith.addf %94, %99 : vector<2x8x32xf32>
    %101 = vector.extract_strided_slice %0 {offsets = [17, 0], sizes = [1, 32], strides = [1, 1]} : vector<32x128xf32> to vector<1x32xf32>
    %102 = vector.shape_cast %101 : vector<1x32xf32> to vector<1x1x32xf32>
    %c0_38 = arith.constant 0 : index
    %c1 = arith.constant 1 : index
    %c0_39 = arith.constant 0 : index
    %103 = vector.load %arg8[%c0_38, %c1, %c0_39] : memref<2x18x32xf32, #tpu.memory_space<vmem>>, vector<2x8x32xf32>
    %104 = vector.broadcast %102 : vector<1x1x32xf32> to vector<2x8x32xf32>
    %105 = arith.mulf %103, %104 : vector<2x8x32xf32>
    %106 = arith.addf %100, %105 : vector<2x8x32xf32>
    %107 = vector.extract_strided_slice %0 {offsets = [18, 0], sizes = [1, 32], strides = [1, 1]} : vector<32x128xf32> to vector<1x32xf32>
    %108 = vector.shape_cast %107 : vector<1x32xf32> to vector<1x1x32xf32>
    %c0_40 = arith.constant 0 : index
    %c2 = arith.constant 2 : index
    %c0_41 = arith.constant 0 : index
    %109 = vector.load %arg8[%c0_40, %c2, %c0_41] : memref<2x18x32xf32, #tpu.memory_space<vmem>>, vector<2x8x32xf32>
    %110 = vector.broadcast %108 : vector<1x1x32xf32> to vector<2x8x32xf32>
    %111 = arith.mulf %109, %110 : vector<2x8x32xf32>
    %112 = arith.addf %106, %111 : vector<2x8x32xf32>
    %113 = vector.extract_strided_slice %0 {offsets = [19, 0], sizes = [1, 32], strides = [1, 1]} : vector<32x128xf32> to vector<1x32xf32>
    %114 = vector.shape_cast %113 : vector<1x32xf32> to vector<1x1x32xf32>
    %c0_42 = arith.constant 0 : index
    %c3 = arith.constant 3 : index
    %c0_43 = arith.constant 0 : index
    %115 = vector.load %arg8[%c0_42, %c3, %c0_43] : memref<2x18x32xf32, #tpu.memory_space<vmem>>, vector<2x8x32xf32>
    %116 = vector.broadcast %114 : vector<1x1x32xf32> to vector<2x8x32xf32>
    %117 = arith.mulf %115, %116 : vector<2x8x32xf32>
    %118 = arith.addf %112, %117 : vector<2x8x32xf32>
    %119 = vector.extract_strided_slice %0 {offsets = [20, 0], sizes = [1, 32], strides = [1, 1]} : vector<32x128xf32> to vector<1x32xf32>
    %120 = vector.shape_cast %119 : vector<1x32xf32> to vector<1x1x32xf32>
    %c0_44 = arith.constant 0 : index
    %c4 = arith.constant 4 : index
    %c0_45 = arith.constant 0 : index
    %121 = vector.load %arg8[%c0_44, %c4, %c0_45] : memref<2x18x32xf32, #tpu.memory_space<vmem>>, vector<2x8x32xf32>
    %122 = vector.broadcast %120 : vector<1x1x32xf32> to vector<2x8x32xf32>
    %123 = arith.mulf %121, %122 : vector<2x8x32xf32>
    %124 = arith.addf %118, %123 : vector<2x8x32xf32>
    %125 = vector.extract_strided_slice %0 {offsets = [21, 0], sizes = [1, 32], strides = [1, 1]} : vector<32x128xf32> to vector<1x32xf32>
    %126 = vector.shape_cast %125 : vector<1x32xf32> to vector<1x1x32xf32>
    %c0_46 = arith.constant 0 : index
    %c5_47 = arith.constant 5 : index
    %c0_48 = arith.constant 0 : index
    %127 = vector.load %arg8[%c0_46, %c5_47, %c0_48] : memref<2x18x32xf32, #tpu.memory_space<vmem>>, vector<2x8x32xf32>
    %128 = vector.broadcast %126 : vector<1x1x32xf32> to vector<2x8x32xf32>
    %129 = arith.mulf %127, %128 : vector<2x8x32xf32>
    %130 = arith.addf %124, %129 : vector<2x8x32xf32>
    %131 = vector.extract_strided_slice %0 {offsets = [22, 0], sizes = [1, 32], strides = [1, 1]} : vector<32x128xf32> to vector<1x32xf32>
    %132 = vector.shape_cast %131 : vector<1x32xf32> to vector<1x1x32xf32>
    %c0_49 = arith.constant 0 : index
    %c6 = arith.constant 6 : index
    %c0_50 = arith.constant 0 : index
    %133 = vector.load %arg8[%c0_49, %c6, %c0_50] : memref<2x18x32xf32, #tpu.memory_space<vmem>>, vector<2x8x32xf32>
    %134 = vector.broadcast %132 : vector<1x1x32xf32> to vector<2x8x32xf32>
    %135 = arith.mulf %133, %134 : vector<2x8x32xf32>
    %136 = arith.addf %130, %135 : vector<2x8x32xf32>
    %137 = vector.extract_strided_slice %0 {offsets = [23, 0], sizes = [1, 32], strides = [1, 1]} : vector<32x128xf32> to vector<1x32xf32>
    %138 = vector.shape_cast %137 : vector<1x32xf32> to vector<1x1x32xf32>
    %c0_51 = arith.constant 0 : index
    %c7 = arith.constant 7 : index
    %c0_52 = arith.constant 0 : index
    %139 = vector.load %arg8[%c0_51, %c7, %c0_52] : memref<2x18x32xf32, #tpu.memory_space<vmem>>, vector<2x8x32xf32>
    %140 = vector.broadcast %138 : vector<1x1x32xf32> to vector<2x8x32xf32>
    %141 = arith.mulf %139, %140 : vector<2x8x32xf32>
    %142 = arith.addf %136, %141 : vector<2x8x32xf32>
    %143 = vector.extract_strided_slice %0 {offsets = [24, 0], sizes = [1, 32], strides = [1, 1]} : vector<32x128xf32> to vector<1x32xf32>
    %144 = vector.shape_cast %143 : vector<1x32xf32> to vector<1x1x32xf32>
    %c0_53 = arith.constant 0 : index
    %c8 = arith.constant 8 : index
    %c0_54 = arith.constant 0 : index
    %145 = vector.load %arg8[%c0_53, %c8, %c0_54] : memref<2x18x32xf32, #tpu.memory_space<vmem>>, vector<2x8x32xf32>
    %146 = vector.broadcast %144 : vector<1x1x32xf32> to vector<2x8x32xf32>
    %147 = arith.mulf %145, %146 : vector<2x8x32xf32>
    %148 = arith.addf %142, %147 : vector<2x8x32xf32>
    %149 = vector.extract_strided_slice %0 {offsets = [25, 0], sizes = [1, 32], strides = [1, 1]} : vector<32x128xf32> to vector<1x32xf32>
    %150 = vector.shape_cast %149 : vector<1x32xf32> to vector<1x1x32xf32>
    %c0_55 = arith.constant 0 : index
    %c9 = arith.constant 9 : index
    %c0_56 = arith.constant 0 : index
    %151 = vector.load %arg8[%c0_55, %c9, %c0_56] : memref<2x18x32xf32, #tpu.memory_space<vmem>>, vector<2x8x32xf32>
    %152 = vector.broadcast %150 : vector<1x1x32xf32> to vector<2x8x32xf32>
    %153 = arith.mulf %151, %152 : vector<2x8x32xf32>
    %154 = arith.addf %148, %153 : vector<2x8x32xf32>
    %155 = vector.extract_strided_slice %0 {offsets = [26, 0], sizes = [1, 32], strides = [1, 1]} : vector<32x128xf32> to vector<1x32xf32>
    %156 = vector.shape_cast %155 : vector<1x32xf32> to vector<1x1x32xf32>
    %c0_57 = arith.constant 0 : index
    %c10 = arith.constant 10 : index
    %c0_58 = arith.constant 0 : index
    %157 = vector.load %arg8[%c0_57, %c10, %c0_58] : memref<2x18x32xf32, #tpu.memory_space<vmem>>, vector<2x8x32xf32>
    %158 = vector.broadcast %156 : vector<1x1x32xf32> to vector<2x8x32xf32>
    %159 = arith.mulf %157, %158 : vector<2x8x32xf32>
    %160 = arith.addf %154, %159 : vector<2x8x32xf32>
    %161 = arith.addf %2, %89 : vector<16x32xf32>
    %162 = vector.shape_cast %160 : vector<2x8x32xf32> to vector<16x32xf32>
    %163 = arith.addf %161, %162 : vector<16x32xf32>
    %164 = vector.extract_strided_slice %0 {offsets = [7, 0], sizes = [1, 32], strides = [1, 1]} : vector<32x128xf32> to vector<1x32xf32>
    %165 = vector.extract_strided_slice %0 {offsets = [8, 0], sizes = [1, 32], strides = [1, 1]} : vector<32x128xf32> to vector<1x32xf32>
    %cst_59 = arith.constant dense<0.000000e+00> : vector<16xf32>
    %166 = vector.multi_reduction <add>, %163, %cst_59 [1] : vector<16x32xf32> to vector<16xf32>
    %167 = vector.shape_cast %166 : vector<16xf32> to vector<16x1xf32>
    %cst_60 = arith.constant 3.200000e+01 : f32
    %168 = vector.broadcast %cst_60 : f32 to vector<16x1xf32>
    %169 = arith.divf %167, %168 : vector<16x1xf32>
    %170 = vector.broadcast %169 : vector<16x1xf32> to vector<16x32xf32>
    %171 = arith.subf %163, %170 : vector<16x32xf32>
    %172 = arith.mulf %171, %171 : vector<16x32xf32>
    %cst_61 = arith.constant dense<0.000000e+00> : vector<16xf32>
    %173 = vector.multi_reduction <add>, %172, %cst_61 [1] : vector<16x32xf32> to vector<16xf32>
    %174 = vector.shape_cast %173 : vector<16xf32> to vector<16x1xf32>
    %cst_62 = arith.constant 3.200000e+01 : f32
    %175 = vector.broadcast %cst_62 : f32 to vector<16x1xf32>
    %176 = arith.divf %174, %175 : vector<16x1xf32>
    %177 = vector.broadcast %169 : vector<16x1xf32> to vector<16x32xf32>
    %178 = arith.subf %163, %177 : vector<16x32xf32>
    %cst_63 = arith.constant 9.99999996E-13 : f32
    %179 = vector.broadcast %cst_63 : f32 to vector<16x1xf32>
    %180 = arith.addf %176, %179 : vector<16x1xf32>
    %181 = math.rsqrt %180 : vector<16x1xf32>
    %182 = vector.broadcast %181 : vector<16x1xf32> to vector<16x32xf32>
    %183 = arith.mulf %178, %182 : vector<16x32xf32>
    %184 = vector.broadcast %164 : vector<1x32xf32> to vector<16x32xf32>
    %185 = arith.mulf %183, %184 : vector<16x32xf32>
    %186 = vector.broadcast %165 : vector<1x32xf32> to vector<16x32xf32>
    %187 = arith.addf %185, %186 : vector<16x32xf32>
    %188 = arith.truncf %187 : vector<16x32xf32> to vector<16x32xbf16>
    %c0_64 = arith.constant 0 : index
    %c0_65 = arith.constant 0 : index
    %c0_66 = arith.constant 0 : index
    %189 = vector.load %arg6[%c0_64, %c0_65, %c0_66] : memref<4x32x32xf32, #tpu.memory_space<vmem>>, vector<1x32x32xf32>
    %190 = vector.shape_cast %189 : vector<1x32x32xf32> to vector<32x32xf32>
    %191 = arith.truncf %190 : vector<32x32xf32> to vector<32x32xbf16>
    %cst_67 = arith.constant dense<0.000000e+00> : vector<16x32xf32>
    %192 = tpu.matmul %188, %191, %cst_67 {dimension_numbers = #tpu.dot_dimension_numbers<[1], [0], [0], [1], [0, 0, 1, 1], [], []>} : vector<16x32xbf16>, vector<32x32xbf16>, vector<16x32xf32> -> vector<16x32xf32>
    %193 = vector.extract_strided_slice %0 {offsets = [9, 0], sizes = [1, 32], strides = [1, 1]} : vector<32x128xf32> to vector<1x32xf32>
    %194 = vector.broadcast %193 : vector<1x32xf32> to vector<16x32xf32>
    %195 = arith.addf %192, %194 : vector<16x32xf32>
    %196 = arith.truncf %4 : vector<32x32xf32> to vector<32x32xbf16>
    %c1_68 = arith.constant 1 : index
    %c0_69 = arith.constant 0 : index
    %c0_70 = arith.constant 0 : index
    %197 = vector.load %arg6[%c1_68, %c0_69, %c0_70] : memref<4x32x32xf32, #tpu.memory_space<vmem>>, vector<1x32x32xf32>
    %198 = vector.shape_cast %197 : vector<1x32x32xf32> to vector<32x32xf32>
    %199 = arith.truncf %198 : vector<32x32xf32> to vector<32x32xbf16>
    %cst_71 = arith.constant dense<0.000000e+00> : vector<32x32xf32>
    %200 = tpu.matmul %196, %199, %cst_71 {dimension_numbers = #tpu.dot_dimension_numbers<[1], [0], [0], [1], [0, 0, 1, 1], [], []>} : vector<32x32xbf16>, vector<32x32xbf16>, vector<32x32xf32> -> vector<32x32xf32>
    %201 = vector.extract_strided_slice %0 {offsets = [10, 0], sizes = [1, 32], strides = [1, 1]} : vector<32x128xf32> to vector<1x32xf32>
    %202 = vector.broadcast %201 : vector<1x32xf32> to vector<32x32xf32>
    %203 = arith.addf %200, %202 : vector<32x32xf32>
    %c2_72 = arith.constant 2 : index
    %c0_73 = arith.constant 0 : index
    %c0_74 = arith.constant 0 : index
    %204 = vector.load %arg6[%c2_72, %c0_73, %c0_74] : memref<4x32x32xf32, #tpu.memory_space<vmem>>, vector<1x32x32xf32>
    %205 = vector.shape_cast %204 : vector<1x32x32xf32> to vector<32x32xf32>
    %206 = arith.truncf %205 : vector<32x32xf32> to vector<32x32xbf16>
    %cst_75 = arith.constant dense<0.000000e+00> : vector<32x32xf32>
    %207 = tpu.matmul %196, %206, %cst_75 {dimension_numbers = #tpu.dot_dimension_numbers<[1], [0], [0], [1], [0, 0, 1, 1], [], []>} : vector<32x32xbf16>, vector<32x32xbf16>, vector<32x32xf32> -> vector<32x32xf32>
    %208 = vector.extract_strided_slice %0 {offsets = [11, 0], sizes = [1, 32], strides = [1, 1]} : vector<32x128xf32> to vector<1x32xf32>
    %209 = vector.broadcast %208 : vector<1x32xf32> to vector<32x32xf32>
    %210 = arith.addf %207, %209 : vector<32x32xf32>
    %211 = arith.truncf %203 : vector<32x32xf32> to vector<32x32xbf16>
    %212 = arith.truncf %210 : vector<32x32xf32> to vector<32x32xbf16>
    %213 = tpu.iota {dimensions = array<i32: 1>} : vector<8x32xi32>
    %c0_i32 = arith.constant 0 : i32
    %214 = vector.broadcast %c0_i32 : i32 to vector<8x32xi32>
    %215 = arith.cmpi sge, %213, %214 : vector<8x32xi32>
    %c8_i32 = arith.constant 8 : i32
    %216 = vector.broadcast %c8_i32 : i32 to vector<8x32xi32>
    %217 = arith.cmpi slt, %213, %216 : vector<8x32xi32>
    %218 = arith.andi %215, %217 : vector<8x32xi1>
    %219 = arith.extui %218 : vector<8x32xi1> to vector<8x32xi32>
    %220 = arith.sitofp %219 : vector<8x32xi32> to vector<8x32xf32>
    %c8_i32_76 = arith.constant 8 : i32
    %221 = vector.broadcast %c8_i32_76 : i32 to vector<8x32xi32>
    %222 = arith.cmpi sge, %213, %221 : vector<8x32xi32>
    %c16_i32 = arith.constant 16 : i32
    %223 = vector.broadcast %c16_i32 : i32 to vector<8x32xi32>
    %224 = arith.cmpi slt, %213, %223 : vector<8x32xi32>
    %225 = arith.andi %222, %224 : vector<8x32xi1>
    %226 = arith.extui %225 : vector<8x32xi1> to vector<8x32xi32>
    %227 = arith.sitofp %226 : vector<8x32xi32> to vector<8x32xf32>
    %c16_i32_77 = arith.constant 16 : i32
    %228 = vector.broadcast %c16_i32_77 : i32 to vector<8x32xi32>
    %229 = arith.cmpi sge, %213, %228 : vector<8x32xi32>
    %c24_i32 = arith.constant 24 : i32
    %230 = vector.broadcast %c24_i32 : i32 to vector<8x32xi32>
    %231 = arith.cmpi slt, %213, %230 : vector<8x32xi32>
    %232 = arith.andi %229, %231 : vector<8x32xi1>
    %233 = arith.extui %232 : vector<8x32xi1> to vector<8x32xi32>
    %234 = arith.sitofp %233 : vector<8x32xi32> to vector<8x32xf32>
    %c24_i32_78 = arith.constant 24 : i32
    %235 = vector.broadcast %c24_i32_78 : i32 to vector<8x32xi32>
    %236 = arith.cmpi sge, %213, %235 : vector<8x32xi32>
    %c32_i32 = arith.constant 32 : i32
    %237 = vector.broadcast %c32_i32 : i32 to vector<8x32xi32>
    %238 = arith.cmpi slt, %213, %237 : vector<8x32xi32>
    %239 = arith.andi %236, %238 : vector<8x32xi1>
    %240 = arith.extui %239 : vector<8x32xi1> to vector<8x32xi32>
    %241 = arith.sitofp %240 : vector<8x32xi32> to vector<8x32xf32>
    %242 = tpu.concatenate %220, %227, %234, %241 in 0 : vector<8x32xf32>, vector<8x32xf32>, vector<8x32xf32>, vector<8x32xf32> -> vector<32x32xf32>
    %243 = vector.extract_strided_slice %195 {offsets = [0, 0], sizes = [8, 32], strides = [1, 1]} : vector<16x32xf32> to vector<8x32xf32>
    %244 = vector.extract_strided_slice %211 {offsets = [0, 0], sizes = [16, 32], strides = [1, 1]} : vector<32x32xbf16> to vector<16x32xbf16>
    %245 = vector.extract_strided_slice %212 {offsets = [0, 0], sizes = [16, 32], strides = [1, 1]} : vector<32x32xbf16> to vector<16x32xbf16>
    %246 = tpu.concatenate %243, %243, %243, %243 in 0 : vector<8x32xf32>, vector<8x32xf32>, vector<8x32xf32>, vector<8x32xf32> -> vector<32x32xf32>
    %247 = arith.mulf %246, %242 : vector<32x32xf32>
    %248 = arith.truncf %247 : vector<32x32xf32> to vector<32x32xbf16>
    %cst_79 = arith.constant dense<0.000000e+00> : vector<32x16xf32>
    %249 = tpu.matmul %248, %244, %cst_79 {dimension_numbers = #tpu.dot_dimension_numbers<[1], [1], [0], [0], [0, 0, 1, 0], [], []>} : vector<32x32xbf16>, vector<16x32xbf16>, vector<32x16xf32> -> vector<32x16xf32>
    %cst_80 = arith.constant 0.353553385 : f32
    %250 = vector.broadcast %cst_80 : f32 to vector<32x16xf32>
    %251 = arith.mulf %249, %250 : vector<32x16xf32>
    %cst_81 = arith.constant dense<0xFF800000> : vector<32xf32>
    %252 = vector.multi_reduction <maximumf>, %251, %cst_81 [1] : vector<32x16xf32> to vector<32xf32>
    %253 = vector.shape_cast %252 : vector<32xf32> to vector<32x1xf32>
    %254 = vector.broadcast %253 : vector<32x1xf32> to vector<32x16xf32>
    %255 = arith.subf %251, %254 : vector<32x16xf32>
    %256 = math.exp %255 : vector<32x16xf32>
    %cst_82 = arith.constant dense<0.000000e+00> : vector<32xf32>
    %257 = vector.multi_reduction <add>, %256, %cst_82 [1] : vector<32x16xf32> to vector<32xf32>
    %258 = vector.shape_cast %257 : vector<32xf32> to vector<32x1xf32>
    %259 = tpu.reciprocal %258 {approx = true} : vector<32x1xf32> -> vector<32x1xf32>
    %260 = vector.broadcast %259 : vector<32x1xf32> to vector<32x16xf32>
    %261 = arith.mulf %256, %260 : vector<32x16xf32>
    %262 = arith.truncf %261 : vector<32x16xf32> to vector<32x16xbf16>
    %cst_83 = arith.constant dense<0.000000e+00> : vector<32x32xf32>
    %263 = tpu.matmul %262, %245, %cst_83 {dimension_numbers = #tpu.dot_dimension_numbers<[1], [0], [0], [1], [0, 0, 1, 1], [], []>} : vector<32x16xbf16>, vector<16x32xbf16>, vector<32x32xf32> -> vector<32x32xf32>
    %264 = arith.mulf %263, %242 : vector<32x32xf32>
    %265 = vector.extract_strided_slice %264 {offsets = [0, 0], sizes = [8, 32], strides = [1, 1]} : vector<32x32xf32> to vector<8x32xf32>
    %266 = vector.extract_strided_slice %264 {offsets = [8, 0], sizes = [8, 32], strides = [1, 1]} : vector<32x32xf32> to vector<8x32xf32>
    %267 = arith.addf %265, %266 : vector<8x32xf32>
    %268 = vector.extract_strided_slice %264 {offsets = [16, 0], sizes = [8, 32], strides = [1, 1]} : vector<32x32xf32> to vector<8x32xf32>
    %269 = arith.addf %267, %268 : vector<8x32xf32>
    %270 = vector.extract_strided_slice %264 {offsets = [24, 0], sizes = [8, 32], strides = [1, 1]} : vector<32x32xf32> to vector<8x32xf32>
    %271 = arith.addf %269, %270 : vector<8x32xf32>
    %272 = vector.extract_strided_slice %195 {offsets = [8, 0], sizes = [8, 32], strides = [1, 1]} : vector<16x32xf32> to vector<8x32xf32>
    %273 = vector.extract_strided_slice %211 {offsets = [16, 0], sizes = [16, 32], strides = [1, 1]} : vector<32x32xbf16> to vector<16x32xbf16>
    %274 = vector.extract_strided_slice %212 {offsets = [16, 0], sizes = [16, 32], strides = [1, 1]} : vector<32x32xbf16> to vector<16x32xbf16>
    %275 = tpu.concatenate %272, %272, %272, %272 in 0 : vector<8x32xf32>, vector<8x32xf32>, vector<8x32xf32>, vector<8x32xf32> -> vector<32x32xf32>
    %276 = arith.mulf %275, %242 : vector<32x32xf32>
    %277 = arith.truncf %276 : vector<32x32xf32> to vector<32x32xbf16>
    %cst_84 = arith.constant dense<0.000000e+00> : vector<32x16xf32>
    %278 = tpu.matmul %277, %273, %cst_84 {dimension_numbers = #tpu.dot_dimension_numbers<[1], [1], [0], [0], [0, 0, 1, 0], [], []>} : vector<32x32xbf16>, vector<16x32xbf16>, vector<32x16xf32> -> vector<32x16xf32>
    %cst_85 = arith.constant 0.353553385 : f32
    %279 = vector.broadcast %cst_85 : f32 to vector<32x16xf32>
    %280 = arith.mulf %278, %279 : vector<32x16xf32>
    %cst_86 = arith.constant dense<0xFF800000> : vector<32xf32>
    %281 = vector.multi_reduction <maximumf>, %280, %cst_86 [1] : vector<32x16xf32> to vector<32xf32>
    %282 = vector.shape_cast %281 : vector<32xf32> to vector<32x1xf32>
    %283 = vector.broadcast %282 : vector<32x1xf32> to vector<32x16xf32>
    %284 = arith.subf %280, %283 : vector<32x16xf32>
    %285 = math.exp %284 : vector<32x16xf32>
    %cst_87 = arith.constant dense<0.000000e+00> : vector<32xf32>
    %286 = vector.multi_reduction <add>, %285, %cst_87 [1] : vector<32x16xf32> to vector<32xf32>
    %287 = vector.shape_cast %286 : vector<32xf32> to vector<32x1xf32>
    %288 = tpu.reciprocal %287 {approx = true} : vector<32x1xf32> -> vector<32x1xf32>
    %289 = vector.broadcast %288 : vector<32x1xf32> to vector<32x16xf32>
    %290 = arith.mulf %285, %289 : vector<32x16xf32>
    %291 = arith.truncf %290 : vector<32x16xf32> to vector<32x16xbf16>
    %cst_88 = arith.constant dense<0.000000e+00> : vector<32x32xf32>
    %292 = tpu.matmul %291, %274, %cst_88 {dimension_numbers = #tpu.dot_dimension_numbers<[1], [0], [0], [1], [0, 0, 1, 1], [], []>} : vector<32x16xbf16>, vector<16x32xbf16>, vector<32x32xf32> -> vector<32x32xf32>
    %293 = arith.mulf %292, %242 : vector<32x32xf32>
    %294 = vector.extract_strided_slice %293 {offsets = [0, 0], sizes = [8, 32], strides = [1, 1]} : vector<32x32xf32> to vector<8x32xf32>
    %295 = vector.extract_strided_slice %293 {offsets = [8, 0], sizes = [8, 32], strides = [1, 1]} : vector<32x32xf32> to vector<8x32xf32>
    %296 = arith.addf %294, %295 : vector<8x32xf32>
    %297 = vector.extract_strided_slice %293 {offsets = [16, 0], sizes = [8, 32], strides = [1, 1]} : vector<32x32xf32> to vector<8x32xf32>
    %298 = arith.addf %296, %297 : vector<8x32xf32>
    %299 = vector.extract_strided_slice %293 {offsets = [24, 0], sizes = [8, 32], strides = [1, 1]} : vector<32x32xf32> to vector<8x32xf32>
    %300 = arith.addf %298, %299 : vector<8x32xf32>
    %301 = tpu.concatenate %271, %300 in 0 : vector<8x32xf32>, vector<8x32xf32> -> vector<16x32xf32>
    %c3_89 = arith.constant 3 : index
    %c0_90 = arith.constant 0 : index
    %c0_91 = arith.constant 0 : index
    %302 = vector.load %arg6[%c3_89, %c0_90, %c0_91] : memref<4x32x32xf32, #tpu.memory_space<vmem>>, vector<1x32x32xf32>
    %303 = vector.shape_cast %302 : vector<1x32x32xf32> to vector<32x32xf32>
    %cst_92 = arith.constant dense<0.000000e+00> : vector<16x32xf32>
    %304 = tpu.matmul %301, %303, %cst_92 {dimension_numbers = #tpu.dot_dimension_numbers<[1], [0], [0], [1], [0, 0, 1, 1], [], []>} : vector<16x32xf32>, vector<32x32xf32>, vector<16x32xf32> -> vector<16x32xf32>
    %305 = vector.extract_strided_slice %0 {offsets = [12, 0], sizes = [1, 32], strides = [1, 1]} : vector<32x128xf32> to vector<1x32xf32>
    %306 = vector.broadcast %305 : vector<1x32xf32> to vector<16x32xf32>
    %307 = arith.addf %304, %306 : vector<16x32xf32>
    %308 = arith.addf %163, %307 : vector<16x32xf32>
    %309 = vector.shape_cast %308 : vector<16x32xf32> to vector<2x8x32xf32>
    %c0_93 = arith.constant 0 : index
    %c0_94 = arith.constant 0 : index
    %c0_95 = arith.constant 0 : index
    %310 = vector.load %arg7[%c0_93, %c0_94, %c0_95] : memref<2x8x32xf32, #tpu.memory_space<vmem>>, vector<2x8x32xf32>
    tpu.vector_store %arg7[%c0_93, %c0_94, %c0_95], %309 {strides = array<i32>} : memref<2x8x32xf32, #tpu.memory_space<vmem>>, vector<2x8x32xf32>,
    return
  }
  func.func @transform_0(%arg0: i32) -> (i32, i32, i32) {
    %c0_i32 = arith.constant 0 : i32
    %c0_i32_0 = arith.constant 0 : i32
    %c0_i32_1 = arith.constant 0 : i32
    %c0_i32_2 = arith.constant 0 : i32
    return %c0_i32, %c0_i32_0, %c0_i32_1 : i32, i32, i32
  }
  func.func @transform_1(%arg0: i32) -> (i32, i32, i32) {
    %c0_i32 = arith.constant 0 : i32
    %c0_i32_0 = arith.constant 0 : i32
    %c0_i32_1 = arith.constant 0 : i32
    %c0_i32_2 = arith.constant 0 : i32
    return %c0_i32, %c0_i32_0, %c0_i32_1 : i32, i32, i32
  }
  func.func @transform_2(%arg0: i32) -> (i32, i32) {
    %c0_i32 = arith.constant 0 : i32
    %c0_i32_0 = arith.constant 0 : i32
    %c0_i32_1 = arith.constant 0 : i32
    return %c0_i32, %c0_i32_0 : i32, i32
  }
  func.func @transform_3(%arg0: i32) -> (i32, i32) {
    %c0_i32 = arith.constant 0 : i32
    %c0_i32_0 = arith.constant 0 : i32
    %c0_i32_1 = arith.constant 0 : i32
    return %c0_i32, %c0_i32_0 : i32, i32
  }
  func.func @transform_4(%arg0: i32) -> (i32, i32) {
    %c0_i32 = arith.constant 0 : i32
    %c0_i32_0 = arith.constant 0 : i32
    %c0_i32_1 = arith.constant 0 : i32
    return %c0_i32, %c0_i32_0 : i32, i32
  }
  func.func @transform_5(%arg0: i32) -> (i32, i32, i32) {
    %c0_i32 = arith.constant 0 : i32
    %c0_i32_0 = arith.constant 0 : i32
    %c0_i32_1 = arith.constant 0 : i32
    %c0_i32_2 = arith.constant 0 : i32
    return %c0_i32, %c0_i32_0, %c0_i32_1 : i32, i32, i32
  }
  func.func @transform_6(%arg0: i32) -> (i32, i32, i32) {
    %c0_i32 = arith.constant 0 : i32
    %c0_i32_0 = arith.constant 0 : i32
    %c0_i32_1 = arith.constant 0 : i32
    %c0_i32_2 = arith.constant 0 : i32
    return %c0_i32, %c0_i32_0, %c0_i32_1 : i32, i32, i32
  }
}

</mosaic_0001>

<bundles_post_ra>
// kernel: tpu_custom_call.1
= control target key start
LH: loop header
LB: loop body
LE: loop exit
PB: predicated region body
PF: predicated region fallthrough
CT: control target
= control target key end

     0   :  { %11 = vsyncpa [#allocation4], 0  ;;  %s1712_s0 = inlined_call_operand.hbm [shape: f32[2,8,32], index: 0, kind: input, shape index: {}]   ;;  %s1713_s1 = inlined_call_operand.vmem [shape: f32[2,16,32], index: 1, kind: input, shape index: {}]   ;;  %s1714_s2 = inlined_call_operand.vmem [shape: f32[32,128], index: 2, kind: input, shape index: {}]   ;;  %s1715_s3 = inlined_call_operand.vmem [shape: f32[32,64], index: 3, kind: input, shape index: {}]   ;;  %s1716_s4 = inlined_call_operand.vmem [shape: f32[64,32], index: 4, kind: input, shape index: {}]   ;;  %s1717_s5 = inlined_call_operand.hbm [shape: f32[4,32,32], index: 5, kind: input, shape index: {}]   ;;  %s1718_s6 = inlined_call_operand.hbm [shape: f32[2,8,32], index: 6, kind: output, shape index: {}]  }
   0x1   :  { %12 = vsyncpa [#allocation7], 0 }
   0x2   :  { %13 = vsyncpa [#allocation5], 0  ;;  %s1390_s21 = smov [#allocation3]  }
   0x3   :  { %s19_s22 = sshll.u32 %s1390_s21, 4  ;;  %s20_s22 = int_to_ptr.vmem [resolvable:$true] %s19_s22 }
   0x4   :  { %s1332_s23 = scalar_lea.vmem %s20_s22, 256  ;;  %p1337_p1 = scmp.lt.s32.totalorder %s20_s22, %s20_s22 }
   0x5   :  { %p1333_p0 = scmp.ne.s32.totalorder %s20_s22, %s1332_s23  ;;  %p1338_p2 = scmp.lt.s32.totalorder %s1332_s23, %s1332_s23 }
   0x7   :  { %p1339_p3 = por %p1338_p2, %p1337_p1 }
   0x9   :  { %p1340_p4 = pnand %p1339_p3, %p1333_p0 }
   0xb   :  { %1343 = shalt.err (!%p1340_p4)
}
   0xc   :  { %s1391_s24 = smov 128   ;;  %s1392_s25 = smov 8  }
   0xd   :  { %25 = dma.hbm_to_vmem [thread:$0]  %s1712_s0, 256, %s20_s22, [#allocation4], %s1391_s24, %s1391_s24, %s1392_s25  }
   0xe   :  { %s1393_s28 = smov [#allocation6]  }
   0xf   :  { %s39_s29 = sshll.u32 %s1393_s28, 4  ;;  %s40_s29 = int_to_ptr.vmem [resolvable:$true] %s39_s29 }
  0x10   :  { %s1352_s30 = scalar_lea.vmem %s40_s29, 2048  ;;  %p1357_p6 = scmp.lt.s32.totalorder %s40_s29, %s40_s29 }
  0x11   :  { %p1353_p5 = scmp.ne.s32.totalorder %s40_s29, %s1352_s30  ;;  %p1358_p7 = scmp.lt.s32.totalorder %s1352_s30, %s1352_s30 }
  0x13   :  { %p1359_p8 = por %p1358_p7, %p1357_p6 }
  0x15   :  { %p1360_p9 = pnand %p1359_p8, %p1353_p5 }
  0x17   :  { %1363 = shalt.err (!%p1360_p9)
}
  0x18   :  { %45 = dma.hbm_to_vmem [thread:$0]  %s1717_s5, 2048, %s40_s29, [#allocation7], %s1391_s24, %s1391_s24, %s1392_s25  }
  0x19   :  { %1384 = dma.done.wait [#allocation4], 256  }
  0x1a   :  { %1385 = vsyncadd [#allocation4], 4294967040 }
  0x1b   :  { %1386 = dma.done.wait [#allocation7], 2048  }
  0x1c   :  { %1387 = vsyncadd [#allocation7], 4294965248  ;;  %vm63_vm0 = vcmask 261120   ;;  %v1444_v0 = vld [vmem:[#allocation3] sm:$0xff]  ;;  %v1446_v1 = vld [vmem:[#allocation3 + $0x8] sm:$0xff]  ;;  %v1394_v17 = vmov 0.0   ;;  %v91_v27 = vlaneseq }
  0x1d   :  { %v64_v2 = vsel %vm63_vm0, %v1444_v0, 0.0  ;;  %v67_v3 = vsel %vm63_vm0, %v1446_v1, 0.0  ;;  %v106_v14 = vld [vmem:[%s1715_s3 + $0x10] sm:$0xff]  ;;  %v107_v15 = vld [vmem:[%s1715_s3 + $0x18] sm:$0xff]  ;;  %v104_v16 = vld [vmem:[%s1715_s3] sm:$0xff]  ;;  %1188 = vmatprep.subr.bf16.mxu0 %v1394_v17  ;;  %295 = vst.msk [vmem:[#allocation2] sm:$0xff] %vm63_vm0, %v1394_v17  ;;  %1196 = vmatprep.subr.bf16.mxu1 %v1394_v17 }
  0x1e   :  { %65 = vadd.xlane.f32.xlu0 %v64_v2  ;;  %296 = vst.msk [vmem:[#allocation2 + $0x8] sm:$0xff] %vm63_vm0, %v1394_v17  ;;  %299 = vst.msk [vmem:[#allocation2 + $0x18] sm:$0xff] %vm63_vm0, %v1394_v17  ;;  %v109_v18 = vpack.c.bf16 %v107_v15, %v106_v14  ;;  %v105_v19 = vld [vmem:[%s1715_s3 + $0x8] sm:$0xff]  ;;  %vm1395_vm1 = vmmov 0   ;;  %v1485_v28 = vshrl.u32 %v91_v27, 7  ;;  %v1493_v30 = vld [vmem:[%s1714_s2] sm:$0xff] }
  0x1f   :  { %300 = vst.msk [vmem:[#allocation2 + $0x20] sm:$0xff] %vm63_vm0, %v1394_v17  ;;  %1192 = vmatprep.mubr.msk.bf16.mxu0 %vm1395_vm1, %v1394_v17  ;;  %1204 = vmatprep.mubr.msk.bf16.mxu1 %vm1395_vm1, %v1394_v17  ;;  %v108_v20 = vpack.c.bf16 %v105_v19, %v104_v16  ;;  %vm160_vm2 = vcmask 523264   ;;  %vm297_vm3 = vcmask 254976   ;;  %vm733_vm14 = vcmask 130048  }
  0x20   :  { %1189 = vmatpush3.bf16.msra.mxu0 %v109_v18  ;;  %v1488_v29 = vsub.s32 0, %v1485_v28  ;;  %v1498_v34 = vsub.s32 1, %v1485_v28  ;;  %v1506_v43 = vsub.s32 2, %v1485_v28  ;;  %298 = vst.msk [vmem:[#allocation2 + $0x10] sm:$0x3] %vm297_vm3, %v1394_v17 }
  0x21   :  { %1190 = vmatprep.subr.bf16.mxu0 %v1394_v17  ;;  %301 = vst.msk [vmem:[#allocation2 + $0x28] sm:$0x3] %vm297_vm3, %v1394_v17 }
  0x22   :  { %68 = vadd.xlane.f32.xlu0 %v67_v3  ;;  %v94_v33 = vrot.slane %v1493_v30, %v1488_v29  ;;  %v100_v38 = vrot.slane %v1493_v30, %v1498_v34  ;;  %v113_v44 = vrot.slane %v1493_v30, %v1506_v43  ;;  %v207_v3 = vld [vmem:[%s1716_s4 + $0x30] sm:$0xff] }
  0x24   :  { %1191 = vmatpush3.bf16.msra.mxu0 %v108_v20 }
  0x25   :  { %1208 = vmatprep.subr.bf16.mxu0 %v1394_v17 }
  0xa7   :  { %v66_v4 = vpop.xlane.xlu0 %65 }
  0xa8   :  { %v71_v5 = vmul.f32 0.03125, %v66_v4  ;;  %v208_v4 = vld [vmem:[%s1716_s4 + $0x38] sm:$0xff] }
  0xaa   :  { %v73_v6 = vsub.f32 %v1444_v0, %v71_v5  ;;  %v205_v5 = vld [vmem:[%s1716_s4 + $0x20] sm:$0xff] }
  0xab   :  { %v69_v7 = vpop.xlane.xlu0 %68 }
  0xac   :  { %v72_v8 = vmul.f32 0.03125, %v69_v7  ;;  %v75_v9 = vmul.f32 %v73_v6, %v73_v6  ;;  %v206_v7 = vld [vmem:[%s1716_s4 + $0x28] sm:$0xff] }
  0xae   :  { %v74_v10 = vsub.f32 %v1446_v1, %v72_v8  ;;  %v77_v11 = vsel %vm63_vm0, %v75_v9, 0.0  ;;  %v211_v8 = vpack.c.bf16 %v206_v7, %v205_v5  ;;  %v203_v9 = vld [vmem:[%s1716_s4 + $0x10] sm:$0xff] }
  0xaf   :  { %78 = vadd.xlane.f32.xlu1 %v77_v11 }
  0xb0   :  { %v76_v12 = vmul.f32 %v74_v10, %v74_v10 }
  0xb2   :  { %v80_v13 = vsel %vm63_vm0, %v76_v12, 0.0  ;;  %v201_v12 = vld [vmem:[%s1716_s4] sm:$0xff] }
  0xb3   :  { %81 = vadd.xlane.f32.xlu1 %v80_v13  ;;  %v202_v13 = vld [vmem:[%s1716_s4 + $0x8] sm:$0xff] }
  0xb4   :  { %v209_v14 = vpack.c.bf16 %v202_v13, %v201_v12  ;;  %v55_v12 = vld [vmem:[%s1714_s2 + $0x10] sm:$0xff] }
 0x138   :  { %v79_v21 = vpop.xlane.xlu1 %78 }
 0x139   :  { %v83_v22 = vmul.f32 0.03125, %v79_v21 }
 0x13b   :  { %v85_v23 = vadd.f32 1e-12, %v83_v22  ;;  %v1542_v22 = vsub.s32 3, %v1485_v28 }
 0x13c   :  { %v82_v24 = vpop.xlane.xlu1 %81 }
 0x13d   :  { %1276 = vrsqrt.f32 %v85_v23  ;;  %v84_v25 = vmul.f32 0.03125, %v82_v24 }
 0x13f   :  { %v86_v26 = vadd.f32 1e-12, %v84_v25  ;;  %v191_v25 = vrot.slane %v1493_v30, %v1542_v22 }
 0x141   :  { %1278 = vrsqrt.f32 %v86_v26  ;;  %v1547_v26 = vsub.s32 4, %v1485_v28 }
 0x14a   :  { %v1277_v31 = vpop.eup %1276 }
 0x14b   :  { %v89_v32 = vmul.f32 %v1277_v31, %v73_v6  ;;  %v212_v6 = vpack.c.bf16 %v208_v4, %v207_v3 }
 0x14d   :  { %v95_v37 = vmul.f32 %v94_v33, %v89_v32  ;;  %1197 = vmatpush3.bf16.msra.mxu1 %v212_v6 }
 0x14e   :  { %v1279_v35 = vpop.eup %1278  ;;  %1198 = vmatprep.subr.bf16.mxu1 %v1394_v17 }
 0x14f   :  { %v90_v36 = vmul.f32 %v1279_v35, %v74_v10  ;;  %v101_v40 = vadd.f32 %v100_v38, %v95_v37  ;;  %v204_v10 = vld [vmem:[%s1716_s4 + $0x18] sm:$0xff]  ;;  %v197_v35 = vrot.slane %v1493_v30, %v1547_v26 }
 0x150   :  { %v210_v11 = vpack.c.bf16 %v204_v10, %v203_v9 }
 0x151   :  { %v96_v39 = vmul.f32 %v94_v33, %v90_v36  ;;  %1199 = vmatpush3.bf16.msra.mxu1 %v211_v8 }
 0x152   :  { %1200 = vmatprep.subr.bf16.mxu1 %v1394_v17 }
 0x153   :  { %v102_v41 = vadd.f32 %v100_v38, %v96_v39 }
 0x155   :  { %v103_v42 = vpack.c.bf16 %v102_v41, %v101_v40  ;;  %1201 = vmatpush3.bf16.msra.mxu1 %v210_v11 }
 0x156   :  { %1202 = vmatprep.subr.bf16.mxu1 %v1394_v17 }
 0x157   :  { %1193 = vmatmul.mubr.msk.bf16.vlgmr.msra.gmra.mxu0 %vm63_vm0, %v103_v42 }
 0x158   :  { %1212 = vmatprep.mubr.msk.bf16.mxu0 %vm1395_vm1, %v1394_v17 }
 0x159   :  { %1203 = vmatpush3.bf16.msra.mxu1 %v209_v14  ;;  %v319_v14 = vrot.slane %v55_v12, %v1498_v34 }
 0x217   :  { %v151_v45 = vpop.f32.mrf.mxu0 }
 0x218   :  { %v152_v46 = vadd.f32 %v151_v45, %v113_v44 }
 0x219   :  { %v1194_v47 = vpop.f32.mrf.mxu0 }
 0x21a   :  { %v158_v48 = vmax.f32 %v152_v46, 0.0 }
 0x21b   :  { %v154_v49 = vpop.f32.mrf.mxu0 }
 0x21c   :  { %v155_v50 = vadd.f32 %v154_v49, %v113_v44  ;;  %v161_v51 = vsel %vm160_vm2, %v158_v48, 0.0 }
 0x21d   :  { %162 = vadd.xlane.f32.xlu0 %v161_v51  ;;  %v1195_v52 = vpop.f32.mrf.mxu0 }
 0x21e   :  { %v159_v53 = vmax.f32 %v155_v50, 0.0 }
 0x220   :  { %v164_v54 = vsel %vm160_vm2, %v159_v53, 0.0 }
 0x221   :  { %165 = vadd.xlane.f32.xlu1 %v164_v54 }
 0x2a6   :  { %v163_v55 = vpop.xlane.xlu0 %162 }
 0x2a7   :  { %v168_v56 = vmul.f32 0.015625, %v163_v55 }
 0x2a9   :  { %v170_v57 = vsub.f32 %v158_v48, %v168_v56 }
 0x2aa   :  { %v166_v58 = vpop.xlane.xlu1 %165 }
 0x2ab   :  { %v169_v59 = vmul.f32 0.015625, %v166_v58  ;;  %v172_v60 = vmul.f32 %v170_v57, %v170_v57 }
 0x2ad   :  { %v171_v61 = vsub.f32 %v159_v53, %v169_v59  ;;  %v174_v62 = vsel %vm160_vm2, %v172_v60, 0.0 }
 0x2ae   :  { %175 = vadd.xlane.f32.xlu0 %v174_v62 }
 0x2af   :  { %v173_v63 = vmul.f32 %v171_v61, %v171_v61 }
 0x2b1   :  { %v177_v2 = vsel %vm160_vm2, %v173_v63, 0.0  ;;  %v285_v63 = vsub.s32 5, %v1485_v28 }
 0x2b2   :  { %178 = vadd.xlane.f32.xlu1 %v177_v2  ;;  %v291_v2 = vsub.s32 6, %v1485_v28 }
 0x2b3   :  { %v286_v3 = vrot.slane %v1493_v30, %v285_v63 }
 0x2b4   :  { %v292_v6 = vrot.slane %v1493_v30, %v291_v2 }
 0x337   :  { %v176_v15 = vpop.xlane.xlu0 %175 }
 0x338   :  { %v180_v16 = vmul.f32 0.015625, %v176_v15  ;;  %v309_v15 = vrot.slane %v55_v12, %v1488_v29 }
 0x33a   :  { %v182_v18 = vadd.f32 1e-12, %v180_v16  ;;  %v329_v16 = vrot.slane %v55_v12, %v1506_v43 }
 0x33b   :  { %v179_v19 = vpop.xlane.xlu1 %178 }
 0x33c   :  { %1280 = vrsqrt.f32 %v182_v18  ;;  %v181_v20 = vmul.f32 0.015625, %v179_v19 }
 0x33e   :  { %v183_v21 = vadd.f32 1e-12, %v181_v20 }
 0x340   :  { %1282 = vrsqrt.f32 %v183_v21  ;;  %v339_v21 = vrot.slane %v55_v12, %v1542_v22 }
 0x349   :  { %v1281_v23 = vpop.eup %1280 }
 0x34a   :  { %v186_v24 = vmul.f32 %v1281_v23, %v170_v57 }
 0x34c   :  { %v192_v33 = vmul.f32 %v191_v25, %v186_v24 }
 0x34d   :  { %v1283_v31 = vpop.eup %1282 }
 0x34e   :  { %v187_v32 = vmul.f32 %v1283_v31, %v171_v61  ;;  %v198_v37 = vadd.f32 %v197_v35, %v192_v33  ;;  %v349_v31 = vrot.slane %v55_v12, %v1547_v26 }
 0x350   :  { %v193_v36 = vmul.f32 %v191_v25, %v187_v32 }
 0x352   :  { %v199_v38 = vadd.f32 %v197_v35, %v193_v36  ;;  %v359_v36 = vrot.slane %v55_v12, %v285_v63 }
 0x354   :  { %v200_v39 = vpack.c.bf16 %v199_v38, %v198_v37  ;;  %v378_v37 = vsub.s32 7, %v1485_v28 }
 0x356   :  { %1205 = vmatmul.mubr.msk.bf16.vlgmr.msra.gmra.mxu1 %vm160_vm2, %v200_v39 }
 0x416   :  { %v250_v40 = vpop.f32.mrf.mxu1 }
 0x417   :  { %v257_v41 = vsel %vm63_vm0, %v250_v40, 0.0 }
 0x418   :  { %258 = vadd.xlane.f32.xlu0 %v257_v41  ;;  %v1206_v42 = vpop.f32.mrf.mxu1 }
 0x41a   :  { %v253_v44 = vpop.f32.mrf.mxu1 }
 0x41b   :  { %v260_v45 = vsel %vm63_vm0, %v253_v44, 0.0 }
 0x41c   :  { %261 = vadd.xlane.f32.xlu1 %v260_v45  ;;  %v1207_v46 = vpop.f32.mrf.mxu1 }
 0x4a1   :  { %v259_v47 = vpop.xlane.xlu0 %258 }
 0x4a2   :  { %v263_v48 = vmul.f32 0.03125, %v259_v47  ;;  %v369_v47 = vrot.slane %v55_v12, %v291_v2 }
 0x4a4   :  { %v265_v49 = vsub.f32 %v250_v40, %v263_v48 }
 0x4a5   :  { %v262_v50 = vpop.xlane.xlu1 %261 }
 0x4a6   :  { %v264_v51 = vmul.f32 0.03125, %v262_v50  ;;  %v267_v52 = vmul.f32 %v265_v49, %v265_v49 }
 0x4a8   :  { %v266_v53 = vsub.f32 %v253_v44, %v264_v51  ;;  %v269_v54 = vsel %vm63_vm0, %v267_v52, 0.0 }
 0x4a9   :  { %270 = vadd.xlane.f32.xlu0 %v269_v54 }
 0x4aa   :  { %v268_v55 = vmul.f32 %v266_v53, %v266_v53 }
 0x4ac   :  { %v272_v56 = vsel %vm63_vm0, %v268_v55, 0.0  ;;  %v379_v55 = vrot.slane %v55_v12, %v378_v37 }
 0x4ad   :  { %273 = vadd.xlane.f32.xlu1 %v272_v56 }
 0x532   :  { %v271_v57 = vpop.xlane.xlu0 %270 }
 0x533   :  { %v275_v58 = vmul.f32 0.03125, %v271_v57 }
 0x535   :  { %v277_v59 = vadd.f32 1e-12, %v275_v58 }
 0x536   :  { %v274_v60 = vpop.xlane.xlu1 %273 }
 0x537   :  { %1284 = vrsqrt.f32 %v277_v59  ;;  %v276_v61 = vmul.f32 0.03125, %v274_v60 }
 0x539   :  { %v278_v62 = vadd.f32 1e-12, %v276_v61 }
 0x53b   :  { %1286 = vrsqrt.f32 %v278_v62 }
 0x544   :  { %v1285_v4 = vpop.eup %1284 }
 0x545   :  { %v281_v5 = vmul.f32 %v1285_v4, %v265_v49  ;;  %v56_v49 = vld [vmem:[%s1714_s2 + $0x18] sm:$0xff] }
 0x546   :  { %v389_v62 = vrot.slane %v56_v49, %v1488_v29 }
 0x547   :  { %v287_v7 = vmul.f32 %v286_v3, %v281_v5 }
 0x548   :  { %v1287_v8 = vpop.eup %1286 }
 0x549   :  { %v1562_v9 = vadd.f32 %v292_v6, %v287_v7  ;;  %v282_v10 = vmul.f32 %v1287_v8, %v266_v53  ;;  %v399_v7 = vrot.slane %v56_v49, %v1498_v34 }
 0x54b   :  { %302 = vst.msk [vmem:[#allocation2 + $0x5] sm:$0xff] %vm63_vm0, %v1562_v9  ;;  %v288_v11 = vmul.f32 %v286_v3, %v282_v10 }
 0x54d   :  { %v1569_v13 = vadd.f32 %v292_v6, %v288_v11 }
 0x54f   :  { %303 = vst.msk [vmem:[#allocation2 + $0x1d] sm:$0xff] %vm63_vm0, %v1569_v13 }
 0x552   :  { %v304_v18 = vld [vmem:[#allocation2] sm:$0xff]  ;;  %v384_v6 = vld [vmem:[#allocation2 + $0x8] sm:$0xff] }
 0x553   :  { %v314_v19 = vld [vmem:[#allocation2 + $0x1] sm:$0xff]  ;;  %v310_v23 = vmul.f32 %v309_v15, %v304_v18 }
 0x554   :  { %v324_v20 = vld [vmem:[#allocation2 + $0x2] sm:$0xff]  ;;  %v320_v24 = vmul.f32 %v319_v14, %v314_v19 }
 0x555   :  { %v334_v25 = vld [vmem:[#allocation2 + $0x3] sm:$0xff]  ;;  %v330_v33 = vmul.f32 %v329_v16, %v324_v20  ;;  %v390_v20 = vmul.f32 %v389_v62, %v384_v6  ;;  %v516_v6 = vld [vmem:[#allocation6 + $0x30] sm:$0xff] }
 0x556   :  { %v322_v32 = vadd.f32 %v320_v24, %v310_v23  ;;  %v344_v35 = vld [vmem:[#allocation2 + $0x4] sm:$0xff]  ;;  %v305_v38 = vld [vmem:[#allocation2 + $0x18] sm:$0xff]  ;;  %v340_v42 = vmul.f32 %v339_v21, %v334_v25 }
 0x557   :  { %v315_v39 = vld [vmem:[#allocation2 + $0x19] sm:$0xff]  ;;  %v311_v44 = vmul.f32 %v309_v15, %v305_v38  ;;  %v354_v46 = vld [vmem:[#allocation2 + $0x5] sm:$0xff]  ;;  %v350_v51 = vmul.f32 %v349_v31, %v344_v35 }
 0x558   :  { %v325_v40 = vld [vmem:[#allocation2 + $0x1a] sm:$0xff]  ;;  %v332_v41 = vadd.f32 %v330_v33, %v322_v32  ;;  %v321_v45 = vmul.f32 %v319_v14, %v315_v39  ;;  %v364_v54 = vld [vmem:[#allocation2 + $0x6] sm:$0xff]  ;;  %v360_v58 = vmul.f32 %v359_v36, %v354_v46 }
 0x559   :  { %v335_v48 = vld [vmem:[#allocation2 + $0x1b] sm:$0xff]  ;;  %v331_v53 = vmul.f32 %v329_v16, %v325_v40  ;;  %v374_v61 = vld [vmem:[#allocation2 + $0x7] sm:$0xff]  ;;  %v370_v3 = vmul.f32 %v369_v47, %v364_v54  ;;  %v409_v16 = vrot.slane %v56_v49, %v1506_v43 }
 0x55a   :  { %v342_v50 = vadd.f32 %v340_v42, %v332_v41  ;;  %v323_v52 = vadd.f32 %v321_v45, %v311_v44  ;;  %v345_v56 = vld [vmem:[#allocation2 + $0x1c] sm:$0xff]  ;;  %v341_v60 = vmul.f32 %v339_v21, %v335_v48  ;;  %v380_v11 = vmul.f32 %v379_v55, %v374_v61  ;;  %v394_v15 = vld [vmem:[#allocation2 + $0x9] sm:$0xff] }
 0x55b   :  { %v355_v63 = vld [vmem:[#allocation2 + $0x1d] sm:$0xff]  ;;  %v351_v5 = vmul.f32 %v349_v31, %v345_v56  ;;  %v404_v24 = vld [vmem:[#allocation2 + $0xa] sm:$0xff]  ;;  %v400_v31 = vmul.f32 %v399_v7, %v394_v15  ;;  %v414_v45 = vadd.f32 %v1562_v9, %v1444_v0 }
 0x55c   :  { %v352_v57 = vadd.f32 %v350_v51, %v342_v50  ;;  %v333_v59 = vadd.f32 %v331_v53, %v323_v52  ;;  %v365_v8 = vld [vmem:[#allocation2 + $0x1e] sm:$0xff]  ;;  %v361_v14 = vmul.f32 %v359_v36, %v355_v63  ;;  %v410_v40 = vmul.f32 %v409_v16, %v404_v24 }
 0x55d   :  { %v375_v18 = vld [vmem:[#allocation2 + $0x1f] sm:$0xff]  ;;  %v371_v23 = vmul.f32 %v369_v47, %v365_v8  ;;  %v415_v53 = vadd.f32 %v1569_v13, %v1446_v1  ;;  %v447_v24 = vrot.slane %v1493_v30, %v378_v37  ;;  %v61_v30 = vld [vmem:[%s1713_s1 + $0x10] sm:$0xff] }
 0x55e   :  { %v362_v2 = vadd.f32 %v360_v58, %v352_v57  ;;  %v343_v4 = vadd.f32 %v341_v60, %v333_v59  ;;  %v385_v25 = vld [vmem:[#allocation2 + $0x20] sm:$0xff]  ;;  %v381_v35 = vmul.f32 %v379_v55, %v375_v18  ;;  %v460_v63 = vld [vmem:[#allocation6 + $0x18] sm:$0xff] }
 0x55f   :  { %v395_v38 = vld [vmem:[#allocation2 + $0x21] sm:$0xff]  ;;  %v391_v42 = vmul.f32 %v389_v62, %v385_v25  ;;  %v459_v62 = vld [vmem:[#allocation6 + $0x10] sm:$0xff] }
 0x560   :  { %v372_v10 = vadd.f32 %v370_v3, %v362_v2  ;;  %v353_v12 = vadd.f32 %v351_v5, %v343_v4  ;;  %v405_v36 = vld [vmem:[#allocation2 + $0x22] sm:$0xff]  ;;  %v401_v48 = vmul.f32 %v399_v7, %v395_v38  ;;  %v462_v3 = vpack.c.bf16 %v460_v63, %v459_v62  ;;  %v517_v7 = vld [vmem:[#allocation6 + $0x38] sm:$0xff] }
 0x561   :  { %v411_v50 = vmul.f32 %v409_v16, %v405_v36  ;;  %v457_v2 = vld [vmem:[#allocation6] sm:$0xff]  ;;  %v458_v4 = vld [vmem:[#allocation6 + $0x8] sm:$0xff]  ;;  %v519_v8 = vpack.c.bf16 %v517_v7, %v516_v6 }
 0x562   :  { %v382_v19 = vadd.f32 %v380_v11, %v372_v10  ;;  %v363_v21 = vadd.f32 %v361_v14, %v353_v12  ;;  %1209 = vmatpush3.bf16.msra.mxu0 %v462_v3  ;;  %v461_v5 = vpack.c.bf16 %v458_v4, %v457_v2  ;;  %v59_v10 = vld [vmem:[%s1713_s1] sm:$0xff]  ;;  %v60_v11 = vld [vmem:[%s1713_s1 + $0x8] sm:$0xff] }
 0x563   :  { %1210 = vmatprep.subr.bf16.mxu0 %v1394_v17  ;;  %v511_v12 = vpack.c.bf16 %v60_v11, %v59_v10  ;;  %v1617_v25 = vld [vmem:[%s1714_s2 + $0x8] sm:$0xff] }
 0x564   :  { %v392_v32 = vadd.f32 %v390_v20, %v382_v19  ;;  %v373_v33 = vadd.f32 %v371_v23, %v363_v21 }
 0x565   :  { %1228 = vmatprep.mubr.msk.bf16.mxu1 %vm63_vm0, %v511_v12 }
 0x566   :  { %v402_v39 = vadd.f32 %v400_v31, %v392_v32  ;;  %v383_v41 = vadd.f32 %v381_v35, %v373_v33  ;;  %1211 = vmatpush3.bf16.msra.mxu0 %v461_v5  ;;  %v453_v35 = vrot.slane %v1617_v25, %v1488_v29  ;;  %v62_v29 = vld [vmem:[%s1713_s1 + $0x18] sm:$0xff]  ;;  %s1396_s1 = smov [#allocation8]  }
 0x567   :  { %1216 = vmatprep.subr.bf16.mxu0 %v519_v8  ;;  %v1629_v37 = vpack.c.bf16 %v62_v29, %v61_v30  ;;  %s1117_s19 = sshll.u32 %s1396_s1, 4  ;;  %s1118_s19 = int_to_ptr.vmem [resolvable:$true] %s1117_s19 }
 0x568   :  { %v412_v44 = vadd.f32 %v410_v40, %v402_v39  ;;  %v393_v46 = vadd.f32 %v391_v42, %v383_v41  ;;  %v514_v39 = vld [vmem:[#allocation6 + $0x20] sm:$0xff]  ;;  %v515_v40 = vld [vmem:[#allocation6 + $0x28] sm:$0xff]  ;;  %s1364_s20 = scalar_lea.vmem %s1118_s19, 256  ;;  %p1369_p11 = scmp.lt.s32.totalorder %s1118_s19, %s1118_s19 }
 0x569   :  { %v518_v28 = vpack.c.bf16 %v515_v40, %v514_v39  ;;  %p1365_p10 = scmp.ne.s32.totalorder %s1118_s19, %s1364_s20  ;;  %p1370_p12 = scmp.lt.s32.totalorder %s1364_s20, %s1364_s20 }
 0x56a   :  { %v1589_v49 = vadd.f32 %v414_v45, %v412_v44  ;;  %v403_v47 = vadd.f32 %v401_v48, %v393_v46  ;;  %v644_v44 = vand.u32 127, %v91_v27  ;;  %v466_v45 = vrot.slane %v1617_v25, %v1498_v34 }
 0x56b   :  { %p1371_p13 = por %p1370_p12, %p1369_p11 }
 0x56c   :  { %v418_v51 = vsel %vm63_vm0, %v1589_v49, 0.0  ;;  %v413_v52 = vadd.f32 %v411_v50, %v403_v47  ;;  %vm650_vm4 = vcmp.ge.s32.totalorder %v644_v44, 8  ;;  %vm651_vm5 = vcmp.lt.s32.totalorder %v644_v44, 16 }
 0x56d   :  { %419 = vadd.xlane.f32.xlu0 %v418_v51  ;;  %vm646_vm6 = vcmp.lt.s32.totalorder %v644_v44, 8  ;;  %vm652_vm7 = vmand %vm650_vm4, %vm651_vm5  ;;  %vm655_vm8 = vcmp.ge.s32.totalorder %v644_v44, 16  ;;  %vm656_vm9 = vcmp.lt.s32.totalorder %v644_v44, 24  ;;  %vm660_vm10 = vcmp.ge.s32.totalorder %v644_v44, 24  ;;  %p1372_p0 = pnand %p1371_p13, %p1365_p10 }
 0x56e   :  { %v1595_v54 = vadd.f32 %v415_v53, %v413_v52  ;;  %v1637_v48 = vsel %vm646_vm6, 1.0, %v1394_v17  ;;  %v1640_v47 = vsel %vm652_vm7, 1.0, %v1394_v17  ;;  %vm661_vm11 = vcmp.lt.s32.totalorder %v644_v44, 32  ;;  %vm657_vm12 = vmand %vm655_vm8, %vm656_vm9 }
 0x56f   :  { %vm662_vm13 = vmand %vm660_vm10, %vm661_vm11  ;;  %v1648_v62 = vsel %vm657_vm12, 1.0, %v1394_v17 }
 0x570   :  { %v421_v55 = vsel %vm63_vm0, %v1595_v54, 0.0  ;;  %v1651_v63 = vsel %vm662_vm13, 1.0, %v1394_v17 }
 0x571   :  { %422 = vadd.xlane.f32.xlu1 %v421_v55 }
 0x5f6   :  { %v420_v0 = vpop.xlane.xlu0 %419 }
 0x5f7   :  { %v424_v9 = vmul.f32 0.03125, %v420_v0 }
 0x5f9   :  { %v426_v56 = vsub.f32 %v1589_v49, %v424_v9 }
 0x5fa   :  { %v423_v57 = vpop.xlane.xlu1 %422 }
 0x5fb   :  { %v425_v58 = vmul.f32 0.03125, %v423_v57  ;;  %v428_v59 = vmul.f32 %v426_v56, %v426_v56  ;;  %v523_v57 = vrot.slane %v1617_v25, %v1506_v43 }
 0x5fd   :  { %v427_v60 = vsub.f32 %v1595_v54, %v425_v58  ;;  %v430_v61 = vsel %vm63_vm0, %v428_v59, 0.0 }
 0x5fe   :  { %431 = vadd.xlane.f32.xlu0 %v430_v61 }
 0x5ff   :  { %v429_v1 = vmul.f32 %v427_v60, %v427_v60 }
 0x601   :  { %v433_v13 = vsel %vm63_vm0, %v429_v1, 0.0 }
 0x602   :  { %434 = vadd.xlane.f32.xlu1 %v433_v13 }
 0x687   :  { %v432_v14 = vpop.xlane.xlu0 %431 }
 0x688   :  { %v436_v15 = vmul.f32 0.03125, %v432_v14 }
 0x68a   :  { %v438_v16 = vadd.f32 1e-12, %v436_v15  ;;  %v582_v15 = vld [vmem:[#allocation6 + $0x50] sm:$0xff] }
 0x68b   :  { %v435_v18 = vpop.xlane.xlu1 %434 }
 0x68c   :  { %1288 = vrsqrt.f32 %v438_v16  ;;  %v437_v19 = vmul.f32 0.03125, %v435_v18  ;;  %v583_v16 = vld [vmem:[#allocation6 + $0x58] sm:$0xff]  ;;  %v580_v18 = vld [vmem:[#allocation6 + $0x40] sm:$0xff] }
 0x68e   :  { %v439_v20 = vadd.f32 1e-12, %v437_v19  ;;  %v585_v19 = vpack.c.bf16 %v583_v16, %v582_v15 }
 0x690   :  { %1290 = vrsqrt.f32 %v439_v20  ;;  %v581_v20 = vld [vmem:[#allocation6 + $0x48] sm:$0xff]  ;;  %1224 = vmatprep.subr.bf16.mxu1 %v585_v19 }
 0x691   :  { %1225 = vmatpush3.bf16.msra.mxu1 %v585_v19 }
 0x699   :  { %v1289_v21 = vpop.eup %1288 }
 0x69a   :  { %v442_v23 = vmul.f32 %v1289_v21, %v426_v56  ;;  %v584_v21 = vpack.c.bf16 %v581_v20, %v580_v18 }
 0x69c   :  { %v448_v33 = vmul.f32 %v447_v24, %v442_v23  ;;  %1226 = vmatprep.subr.bf16.mxu1 %v584_v21 }
 0x69d   :  { %v1291_v32 = vpop.eup %1290  ;;  %1227 = vmatpush3.bf16.msra.mxu1 %v584_v21 }
 0x69e   :  { %v443_v31 = vmul.f32 %v1291_v32, %v427_v60  ;;  %v454_v41 = vadd.f32 %v453_v35, %v448_v33 }
 0x6a0   :  { %v449_v38 = vmul.f32 %v447_v24, %v443_v31  ;;  %1229 = vmatmul.mubr.msk.bf16.vlgmr.msra.gmra.mxu1 %vm63_vm0, %v1629_v37 }
 0x6a2   :  { %v455_v42 = vadd.f32 %v453_v35, %v449_v38 }
 0x6a4   :  { %v456_v36 = vpack.c.bf16 %v455_v42, %v454_v41 }
 0x6a6   :  { %1213 = vmatmul.mubr.msk.bf16.vlgmr.msra.gmra.mxu0 %vm63_vm0, %v456_v36 }
 0x6a7   :  { %1217 = vmatpush3.bf16.msra.mxu0 %v519_v8  ;;  %1220 = vmatprep.mubr.msk.bf16.mxu0 %vm63_vm0, %v511_v12 }
 0x6a8   :  { %1218 = vmatprep.subr.bf16.mxu0 %v518_v28 }
 0x6ab   :  { %1219 = vmatpush3.bf16.msra.mxu0 %v518_v28 }
 0x6ae   :  { %1221 = vmatmul.mubr.msk.bf16.vlgmr.msra.gmra.mxu0 %vm63_vm0, %v1629_v37 }
 0x766   :  { %v504_v46 = vpop.f32.mrf.mxu0 }
 0x767   :  { %v505_v50 = vadd.f32 %v504_v46, %v466_v45 }
 0x768   :  { %v1214_v51 = vpop.f32.mrf.mxu0 }
 0x769   :  { %v665_v52 = vmul.f32 %v1637_v48, %v505_v50  ;;  %v666_v27 = vmul.f32 %v1640_v47, %v505_v50  ;;  %v667_v4 = vmul.f32 %v1648_v62, %v505_v50  ;;  %v668_v5 = vmul.f32 %v1651_v63, %v505_v50 }
 0x76a   :  { %v507_v53 = vpop.f32.mrf.mxu0 }
 0x76b   :  { %v669_v55 = vpack.c.bf16 %v666_v27, %v665_v52  ;;  %v508_v2 = vadd.f32 %v507_v53, %v466_v45  ;;  %v670_v8 = vpack.c.bf16 %v668_v5, %v667_v4 }
 0x76c   :  { %v1215_v0 = vpop.f32.mrf.mxu0 }
 0x76d   :  { %1234 = vmatprep.mubr.msk.bf16.mxu0 %vm63_vm0, %v669_v55  ;;  %v842_v6 = vmul.f32 %v1637_v48, %v508_v2  ;;  %v843_v7 = vmul.f32 %v1640_v47, %v508_v2  ;;  %v844_v11 = vmul.f32 %v1648_v62, %v508_v2  ;;  %v845_v12 = vmul.f32 %v1651_v63, %v508_v2 }
 0x76e   :  { %v1222_v34 = vpop.f32.mrf.mxu0 }
 0x76f   :  { %v573_v1 = vadd.f32 %v1222_v34, %v523_v57  ;;  %v846_v17 = vpack.c.bf16 %v843_v7, %v842_v6  ;;  %v847_v14 = vpack.c.bf16 %v845_v12, %v844_v11 }
 0x770   :  { %v564_v9 = vpop.f32.mrf.mxu0 }
 0x771   :  { %v565_v59 = vadd.f32 %v564_v9, %v523_v57 }
 0x772   :  { %v1223_v56 = vpop.f32.mrf.mxu0 }
 0x773   :  { %v576_v60 = vadd.f32 %v1223_v56, %v523_v57 }
 0x774   :  { %v567_v58 = vpop.f32.mrf.mxu0 }
 0x775   :  { %v568_v61 = vadd.f32 %v567_v58, %v523_v57  ;;  %v640_v3 = vpack.c.bf16 %v576_v60, %v573_v1 }
 0x777   :  { %v639_v13 = vpack.c.bf16 %v568_v61, %v565_v59  ;;  %v855_v10 = vsel %vm63_vm0, %v640_v3, 0 }
 0x779   :  { %1267 = vmatprep.subr.msk.bf16.mxu0 %vm63_vm0, %v639_v13  ;;  %v678_v43 = vsel %vm63_vm0, %v639_v13, 0 }
 0x77a   :  { %1233 = vmatpush3.bf16.xpose.msra.mxu0 %v678_v43 }
 0x77b   :  { %1268 = vmatprep.subr.msk.bf16.mxu0 %vm63_vm0, %v640_v3 }
 0x781   :  { %1235 = vmatmul.mubr.msk.bf16.vlgmr.msra.gmra.mxu0 %vm63_vm0, %v670_v8 }
 0x782   :  { %1245 = vmatpush3.bf16.xpose.msra.mxu0 %v855_v10  ;;  %1246 = vmatprep.mubr.msk.bf16.mxu0 %vm63_vm0, %v846_v17 }
 0x789   :  { %1247 = vmatmul.mubr.msk.bf16.vlgmr.msra.gmra.mxu0 %vm63_vm0, %v847_v14 }
 0x841   :  { %v1236_v23 = vpop.f32.mrf.mxu0 }
 0x842   :  { %v731_v33 = vmul.f32 0.35355338, %v1236_v23  ;;  %v1230_v23 = vpop.f32.mrf.mxu1 }
 0x843   :  { %v714_v24 = vpop.f32.mrf.mxu0 }
 0x844   :  { %v729_v32 = vmul.f32 0.35355338, %v714_v24  ;;  %v740_v42 = vsel %vm733_vm14, %v731_v33, -inf }
 0x845   :  { %v1237_v31 = vpop.f32.mrf.mxu0 }
 0x846   :  { %v734_v35 = vsel %vm733_vm14, %v729_v32, -inf  ;;  %v732_v41 = vmul.f32 0.35355338, %v1237_v31 }
 0x847   :  { %735 = vmax.xlane.f32.xlu0 %v734_v35  ;;  %v717_v38 = vpop.f32.mrf.mxu0  ;;  %v589_v35 = vrot.slane %v1617_v25, %v1542_v22 }
 0x848   :  { %v730_v39 = vmul.f32 0.35355338, %v717_v38  ;;  %v743_v45 = vsel %vm733_vm14, %v732_v41, -inf  ;;  %v624_v38 = vpop.f32.mrf.mxu1 }
 0x849   :  { %v1248_v40 = vpop.f32.mrf.mxu0 }
 0x84a   :  { %v737_v36 = vsel %vm733_vm14, %v730_v39, -inf  ;;  %v908_v37 = vmul.f32 0.35355338, %v1248_v40 }
 0x84b   :  { %741 = vmax.xlane.f32.xlu0 %v740_v42  ;;  %v891_v28 = vpop.f32.mrf.mxu0  ;;  %738 = vmax.xlane.f32.xlu1 %v737_v36  ;;  %v1231_v42 = vpop.f32.mrf.mxu1 }
 0x84c   :  { %v906_v30 = vmul.f32 0.35355338, %v891_v28  ;;  %v916_v52 = vsel %vm733_vm14, %v908_v37, -inf  ;;  %v633_v28 = vadd.f32 %v1230_v23, %v589_v35 }
 0x84d   :  { %v1249_v29 = vpop.f32.mrf.mxu0 }
 0x84e   :  { %v910_v44 = vsel %vm733_vm14, %v906_v30, -inf  ;;  %v909_v51 = vmul.f32 0.35355338, %v1249_v29  ;;  %v636_v29 = vadd.f32 %v1231_v42, %v589_v35 }
 0x84f   :  { %911 = vmax.xlane.f32.xlu0 %v910_v44  ;;  %v894_v46 = vpop.f32.mrf.mxu0  ;;  %744 = vmax.xlane.f32.xlu1 %v743_v45  ;;  %v627_v44 = vpop.f32.mrf.mxu1 }
 0x850   :  { %v907_v50 = vmul.f32 0.35355338, %v894_v46  ;;  %v919_v53 = vsel %vm733_vm14, %v909_v51, -inf  ;;  %v628_v45 = vadd.f32 %v627_v44, %v589_v35  ;;  %v642_v46 = vpack.c.bf16 %v636_v29, %v633_v28 }
 0x852   :  { %v913_v27 = vsel %vm733_vm14, %v907_v50, -inf }
 0x853   :  { %917 = vmax.xlane.f32.xlu0 %v916_v52  ;;  %914 = vmax.xlane.f32.xlu1 %v913_v27 }
 0x857   :  { %920 = vmax.xlane.f32.xlu1 %v919_v53 }
 0x8d0   :  { %v736_v55 = vpop.xlane.xlu0 %735 }
 0x8d1   :  { %v746_v0 = vsub.f32 %v729_v32, %v736_v55 }
 0x8d3   :  { %v750_v34 = vmul.f32 1.442695, %v746_v0 }
 0x8d4   :  { %v742_v9 = vpop.xlane.xlu0 %741  ;;  %v739_v56 = vpop.xlane.xlu1 %738 }
 0x8d5   :  { %1292 = vpow2.f32 %v750_v34  ;;  %v748_v57 = vsub.f32 %v731_v33, %v742_v9  ;;  %v747_v58 = vsub.f32 %v730_v39, %v739_v56 }
 0x8d7   :  { %v754_v59 = vmul.f32 1.442695, %v748_v57  ;;  %v752_v60 = vmul.f32 1.442695, %v747_v58 }
 0x8d8   :  { %v912_v61 = vpop.xlane.xlu0 %911  ;;  %v745_v1 = vpop.xlane.xlu1 %744 }
 0x8d9   :  { %1294 = vpow2.f32 %v754_v59  ;;  %v922_v13 = vsub.f32 %v906_v30, %v912_v61  ;;  %v749_v2 = vsub.f32 %v732_v41, %v745_v1  ;;  %v625_v30 = vadd.f32 %v624_v38, %v589_v35 }
 0x8da   :  { %1296 = vpow2.f32 %v752_v60 }
 0x8db   :  { %v926_v3 = vmul.f32 1.442695, %v922_v13  ;;  %v756_v43 = vmul.f32 1.442695, %v749_v2  ;;  %v641_v22 = vpack.c.bf16 %v628_v45, %v625_v30 }
 0x8dc   :  { %v918_v4 = vpop.xlane.xlu0 %917  ;;  %v915_v5 = vpop.xlane.xlu1 %914 }
 0x8dd   :  { %1298 = vpow2.f32 %v926_v3  ;;  %v924_v6 = vsub.f32 %v908_v37, %v918_v4  ;;  %v923_v7 = vsub.f32 %v907_v50, %v915_v5  ;;  %1238 = vmatprep.subr.bf16.mxu1 %v641_v22 }
 0x8de   :  { %1300 = vpow2.f32 %v756_v43  ;;  %1239 = vmatpush3.bf16.msra.mxu1 %v641_v22 }
 0x8df   :  { %v930_v8 = vmul.f32 1.442695, %v924_v6  ;;  %v928_v17 = vmul.f32 1.442695, %v923_v7  ;;  %1250 = vmatprep.subr.bf16.mxu1 %v642_v46 }
 0x8e0   :  { %v921_v10 = vpop.xlane.xlu1 %920 }
 0x8e1   :  { %1302 = vpow2.f32 %v930_v8  ;;  %v925_v11 = vsub.f32 %v909_v51, %v921_v10 }
 0x8e2   :  { %v1293_v12 = vpop.eup %1292  ;;  %1304 = vpow2.f32 %v928_v17 }
 0x8e3   :  { %v932_v14 = vmul.f32 1.442695, %v925_v11  ;;  %v758_v15 = vsel %vm733_vm14, %v1293_v12, 0.0 }
 0x8e4   :  { %759 = vadd.xlane.f32.xlu0 %v758_v15  ;;  %v1020_v15 = vld [vmem:[#allocation6 + $0x68] sm:$0xff] }
 0x8e5   :  { %1306 = vpow2.f32 %v932_v14  ;;  %v1021_v14 = vld [vmem:[#allocation6 + $0x70] sm:$0xff] }
 0x8e6   :  { %v1295_v16 = vpop.eup %1294 }
 0x8e7   :  { %v1297_v18 = vpop.eup %1296  ;;  %v764_v19 = vsel %vm733_vm14, %v1295_v16, 0.0 }
 0x8e8   :  { %765 = vadd.xlane.f32.xlu0 %v764_v19  ;;  %v761_v20 = vsel %vm733_vm14, %v1297_v18, 0.0 }
 0x8e9   :  { %762 = vadd.xlane.f32.xlu1 %v761_v20 }
 0x8ea   :  { %v1299_v21 = vpop.eup %1298 }
 0x8eb   :  { %v1301_v24 = vpop.eup %1300  ;;  %v934_v32 = vsel %vm733_vm14, %v1299_v21, 0.0 }
 0x8ec   :  { %935 = vadd.xlane.f32.xlu0 %v934_v32  ;;  %v767_v31 = vsel %vm733_vm14, %v1301_v24, 0.0 }
 0x8ed   :  { %768 = vadd.xlane.f32.xlu1 %v767_v31 }
 0x8ee   :  { %v1303_v33 = vpop.eup %1302 }
 0x8ef   :  { %v1305_v39 = vpop.eup %1304  ;;  %v940_v40 = vsel %vm733_vm14, %v1303_v33, 0.0 }
 0x8f0   :  { %941 = vadd.xlane.f32.xlu0 %v940_v40  ;;  %v937_v41 = vsel %vm733_vm14, %v1305_v39, 0.0 }
 0x8f1   :  { %938 = vadd.xlane.f32.xlu1 %v937_v41 }
 0x8f2   :  { %v1307_v36 = vpop.eup %1306 }
 0x8f3   :  { %v943_v37 = vsel %vm733_vm14, %v1307_v36, 0.0 }
 0x8f5   :  { %944 = vadd.xlane.f32.xlu1 %v943_v37 }
 0x96d   :  { %v760_v50 = vpop.xlane.xlu0 %759 }
 0x96e   :  { %1308 = vrcp.f32 %v760_v50 }
 0x971   :  { %v766_v51 = vpop.xlane.xlu0 %765 }
 0x972   :  { %v763_v52 = vpop.xlane.xlu1 %762 }
 0x973   :  { %1310 = vrcp.f32 %v763_v52 }
 0x974   :  { %1312 = vrcp.f32 %v766_v51 }
 0x975   :  { %v936_v27 = vpop.xlane.xlu0 %935 }
 0x976   :  { %v769_v53 = vpop.xlane.xlu1 %768 }
 0x977   :  { %1314 = vrcp.f32 %v769_v53 }
 0x978   :  { %1316 = vrcp.f32 %v936_v27 }
 0x979   :  { %v942_v55 = vpop.xlane.xlu0 %941 }
 0x97a   :  { %v939_v0 = vpop.xlane.xlu1 %938 }
 0x97b   :  { %1318 = vrcp.f32 %v939_v0  ;;  %v1309_v34 = vpop.eup %1308 }
 0x97c   :  { %1320 = vrcp.f32 %v942_v55  ;;  %v774_v57 = vmul.f32 %v1309_v34, %v1293_v12  ;;  %v1022_v12 = vld [vmem:[#allocation6 + $0x78] sm:$0xff] }
 0x97d   :  { %1256 = vmatprep.subr.mxu0 %v1022_v12 }
 0x97e   :  { %v945_v9 = vpop.xlane.xlu1 %944  ;;  %1257 = vmatpush3.msra.mxu0 %v1022_v12 }
 0x97f   :  { %1322 = vrcp.f32 %v945_v9  ;;  %1258 = vmatprep.subr.mxu0 %v1021_v14 }
 0x980   :  { %v1311_v56 = vpop.eup %1310  ;;  %1259 = vmatpush3.msra.mxu0 %v1021_v14 }
 0x981   :  { %v775_v58 = vmul.f32 %v1311_v56, %v1297_v18  ;;  %v1313_v59 = vpop.eup %1312  ;;  %1260 = vmatprep.subr.mxu0 %v1020_v15 }
 0x982   :  { %v776_v1 = vmul.f32 %v1313_v59, %v1295_v16  ;;  %v1019_v16 = vld [vmem:[#allocation6 + $0x60] sm:$0xff]  ;;  %1261 = vmatpush3.msra.mxu0 %v1020_v15 }
 0x983   :  { %v778_v60 = vpack.c.bf16 %v775_v58, %v774_v57  ;;  %1262 = vmatprep.subr.mxu0 %v1019_v16 }
 0x984   :  { %v1315_v61 = vpop.eup %1314  ;;  %1263 = vmatpush3.msra.mxu0 %v1019_v16 }
 0x985   :  { %1240 = vmatprep.mubr.msk.bf16.mxu1 %vm733_vm14, %v778_v60  ;;  %v777_v13 = vmul.f32 %v1315_v61, %v1301_v24  ;;  %v1317_v2 = vpop.eup %1316 }
 0x986   :  { %v950_v4 = vmul.f32 %v1317_v2, %v1299_v21 }
 0x987   :  { %v779_v3 = vpack.c.bf16 %v777_v13, %v776_v1 }
 0x988   :  { %v1319_v43 = vpop.eup %1318 }
 0x989   :  { %1241 = vmatmul.mubr.msk.bf16.vlgmr.msra.gmra.mxu1 %vm733_vm14, %v779_v3  ;;  %v951_v5 = vmul.f32 %v1319_v43, %v1305_v39  ;;  %v1321_v6 = vpop.eup %1320 }
 0x98a   :  { %1251 = vmatpush3.bf16.msra.mxu1 %v642_v46  ;;  %v952_v17 = vmul.f32 %v1321_v6, %v1303_v33  ;;  %v1026_v46 = vrot.slane %v1617_v25, %v1547_v26 }
 0x98b   :  { %v954_v7 = vpack.c.bf16 %v951_v5, %v950_v4 }
 0x98c   :  { %v1323_v8 = vpop.eup %1322 }
 0x98d   :  { %v953_v10 = vmul.f32 %v1323_v8, %v1307_v36  ;;  %1252 = vmatprep.mubr.msk.bf16.mxu1 %vm733_vm14, %v954_v7 }
 0x98f   :  { %v955_v11 = vpack.c.bf16 %v953_v10, %v952_v17 }
 0x991   :  { %1253 = vmatmul.mubr.msk.bf16.vlgmr.msra.gmra.mxu1 %vm733_vm14, %v955_v11 }
 0xa49   :  { %v1242_v18 = vpop.f32.mrf.mxu1 }
 0xa4a   :  { %v837_v31 = vmul.f32 %v1242_v18, %v1648_v62 }
 0xa4b   :  { %v820_v19 = vpop.f32.mrf.mxu1 }
 0xa4c   :  { %v835_v23 = vmul.f32 %v1637_v48, %v820_v19 }
 0xa4d   :  { %v1243_v20 = vpop.f32.mrf.mxu1 }
 0xa4e   :  { %v838_v38 = vmul.f32 %v1243_v20, %v1651_v63 }
 0xa4f   :  { %v823_v21 = vpop.f32.mrf.mxu1 }
 0xa50   :  { %v836_v24 = vmul.f32 %v1640_v47, %v823_v21 }
 0xa51   :  { %v1254_v32 = vpop.f32.mrf.mxu1 }
 0xa52   :  { %v839_v33 = vadd.f32 %v836_v24, %v835_v23  ;;  %v1013_v30 = vmul.f32 %v1254_v32, %v1648_v62 }
 0xa53   :  { %v996_v35 = vpop.f32.mrf.mxu1 }
 0xa54   :  { %v840_v39 = vadd.f32 %v839_v33, %v837_v31  ;;  %v1011_v36 = vmul.f32 %v1637_v48, %v996_v35 }
 0xa55   :  { %v1255_v40 = vpop.f32.mrf.mxu1 }
 0xa56   :  { %v841_v41 = vadd.f32 %v840_v39, %v838_v38  ;;  %v1014_v37 = vmul.f32 %v1255_v40, %v1651_v63 }
 0xa57   :  { %v999_v42 = vpop.f32.mrf.mxu1 }
 0xa58   :  { %v1012_v28 = vmul.f32 %v1640_v47, %v999_v42  ;;  %1264 = vmatprep.mubr.msk.f32.mxu0 %vm63_vm0, %v841_v41 }
 0xa5a   :  { %v1015_v29 = vadd.f32 %v1012_v28, %v1011_v36 }
 0xa5c   :  { %v1016_v44 = vadd.f32 %v1015_v29, %v1013_v30 }
 0xa5e   :  { %v1017_v45 = vadd.f32 %v1016_v44, %v1014_v37 }
 0xa60   :  { %1265 = vmatmul.mubr.msk.f32.vlgmr.msra.gmra.mxu0 %vm63_vm0, %v1017_v45 }
 0xb20   :  { %v1266_v22 = vpop.f32.mrf.mxu0 }
 0xb21   :  { %v1105_v50 = vadd.f32 %v1266_v22, %v1026_v46 }
 0xb22   :  { %v1099_v51 = vpop.f32.mrf.mxu0 }
 0xb23   :  { %v1109_v48 = vadd.f32 %v1105_v50, %v1595_v54  ;;  %v1100_v47 = vadd.f32 %v1099_v51, %v1026_v46 }
 0xb25   :  { %1111 = vst.msk [vmem:[#allocation8 + $0x8] sm:$0xff] %vm63_vm0, %v1109_v48  ;;  %v1108_v62 = vadd.f32 %v1100_v47, %v1589_v49 }
 0xb27   :  { %1110 = vst.msk [vmem:[#allocation8] sm:$0xff] %vm63_vm0, %v1108_v62 }
 0xb28   :  { %1375 = shalt.err (!%p1372_p0)
}
 0xb29   :  { %1123 = dma.vmem_to_hbm [thread:$0]  %s1118_s19, 256, %s1718_s6, [#allocation5], %s1391_s24, %s1391_s24, %s1392_s25  }
 0xb2a   :  { %1388 = dma.done.wait [#allocation5], 256  }
 0xb2b   :  { %1389 = vsyncadd [#allocation5], 4294967040 }
 0xb2c   :  { %1127 = vsyncpa [#allocation4], 1 }
 0xb2d   :  { %1128 = vsyncpa [#allocation7], 1 }
 0xb2e   :  { %1129 = vsyncpa [#allocation5], 1 }

</bundles_post_ra>
